<compile_context>
chip_gen: v7x
topology: tpu7x:2x2x1
jax: 0.10.0
libtpu: 0.0.40
codegen_flags: <defaults>
</compile_context>

<pallas_src>
import functools

import jax
import jax.numpy as jnp
from jax.experimental import pallas as pl
from jax.experimental.pallas import tpu as pltpu


def _round_up(n, m):
    return ((n + m - 1) // m) * m


def _encoder_kernel(x_ref, w1_ref, b1_ref, w2_ref, b2_ref, o_ref):
    """One batch tile of the 2-layer MLP: relu(x@W1+b1) @ W2 + b2."""
    x = x_ref[...]                                    # (tb, d_in) bf16
    # hidden layer: bf16 MXU matmul with f32 accumulation, f32 bias + ReLU (VPU)
    h = jnp.dot(x, w1_ref[...], preferred_element_type=jnp.float32)
    h = jnp.maximum(h + b1_ref[...], 0.0)             # (tb, hidden) f32
    # output layer (lane-padded to a multiple of 128 for dense stores)
    o = jnp.dot(h.astype(w2_ref.dtype), w2_ref[...],
                preferred_element_type=jnp.float32)
    o_ref[...] = (o + b2_ref[...]).astype(o_ref.dtype)


def _vmem_estimate(tb, d_in, hidden, d_out_p):
    """Rough per-call VMEM footprint (worst case: everything double-buffered)."""
    bf16, f32 = 2, 4
    x_tiles = 2 * tb * d_in * bf16
    o_tiles = 2 * tb * d_out_p * f32
    weights = 2 * (d_in * hidden * bf16 + hidden * f32
                   + hidden * d_out_p * bf16 + d_out_p * f32)
    interm = tb * hidden * f32 + tb * d_out_p * f32
    return x_tiles + o_tiles + weights + interm


@functools.partial(jax.jit, static_argnames=("tb", "single_buffer_weights"))
def _pallas_encoder(x2d, w1p, b1p, w2p, b2p, *, tb, single_buffer_weights):
    batch, d_in = x2d.shape
    hidden = w1p.shape[1]
    d_out_p = w2p.shape[1]

    # Resident operands (constant index_map) don't need double-buffering.
    resident = {"pipeline_mode": pl.Buffered(1)} if single_buffer_weights else {}

    est = _vmem_estimate(tb, d_in, hidden, d_out_p)
    vmem_limit = int(min(max(2 * est, 16 << 20), 48 << 20))  # safe on v7x 64MiB

    grid = (pl.cdiv(batch, tb),)

    return pl.pallas_call(
        _encoder_kernel,
        out_shape=jax.ShapeDtypeStruct((batch, d_out_p), jnp.float32),
        grid_spec=pltpu.PrefetchScalarGridSpec(
            num_scalar_prefetch=0,
            grid=grid,
            in_specs=[
                # batch tile of the flattened bf16 input (double-buffered)
                pl.BlockSpec((tb, d_in), lambda i: (i, 0)),
                # weights / biases: full arrays, resident across the grid
                pl.BlockSpec((d_in, hidden), lambda i: (0, 0), **resident),
                pl.BlockSpec((1, hidden), lambda i: (0, 0), **resident),
                pl.BlockSpec((hidden, d_out_p), lambda i: (0, 0), **resident),
                pl.BlockSpec((1, d_out_p), lambda i: (0, 0), **resident),
            ],
            out_specs=pl.BlockSpec((tb, d_out_p), lambda i: (i, 0)),
        ),
        compiler_params=pltpu.CompilerParams(
            dimension_semantics=("parallel",),
            vmem_limit_bytes=vmem_limit),
    )(x2d, w1p, b1p, w2p, b2p)


def prepare_encoder_params(w1, b1, w2, b2, *, latent_size):
    """One-time parameter prep (outside the per-step forward).

    Weights arrive as (in_features, out_features) = torch weight.T.
    Casts W1/W2 to bf16, biases to f32 rows, and zero-pads the output layer to
    a lane-dense width (multiple of 128).
    """
    hidden = w1.shape[1]
    d_out = 2 * latent_size
    d_out_p = _round_up(d_out, 128)
    w1p = w1.astype(jnp.bfloat16)
    b1p = b1.reshape(1, hidden).astype(jnp.float32)
    w2p = jnp.zeros((hidden, d_out_p), jnp.bfloat16)
    w2p = w2p.at[:, :d_out].set(w2.astype(jnp.bfloat16))
    b2p = jnp.zeros((1, d_out_p), jnp.float32)
    b2p = b2p.at[0, :d_out].set(b2.astype(jnp.float32))
    return w1p, b1p, w2p, b2p


def encoder_forward(x, params, *, input_h, input_w, latent_size, tb=256):
    """Equivalent of Encoder.forward(x)."""
    d_in = input_h * input_w
    d_out = 2 * latent_size
    w1p, b1p, w2p, b2p = params

    # x.view(-1, input_h * input_w)  (glue reshape, stays in plain JAX)
    x2d = x.reshape(-1, d_in).astype(jnp.bfloat16)
    batch = x2d.shape[0]

    # Don't let the tile exceed the (sublane-rounded) batch.
    tb_eff = int(min(tb, max(_round_up(batch, 8), 8)))

    try:
        out = _pallas_encoder(x2d, w1p, b1p, w2p, b2p,
                              tb=tb_eff, single_buffer_weights=True)
    except Exception:
        # pl.Buffered(1) not supported by this jax/Mosaic version ->
        # fall back to default double-buffered resident weights.
        out = _pallas_encoder(x2d, w1p, b1p, w2p, b2p,
                              tb=tb_eff, single_buffer_weights=False)

    # drop lane padding, then x.view(-1, 2, latent_size)
    return out[:, :d_out].reshape(-1, 2, latent_size)


def init_encoder_params(key, input_h, input_w, hidden_size, latent_size):
    """Deterministic synthetic parameters (shapes match the nn.Linear layers).

    Weights are stored as (in_features, out_features) = torch weight.T.
    """
    d_in = input_h * input_w
    d_out = 2 * latent_size
    k1, k2, k3, k4 = jax.random.split(key, 4)
    s1 = 1.0 / jnp.sqrt(d_in)
    s2 = 1.0 / jnp.sqrt(hidden_size)
    w1 = jax.random.uniform(k1, (d_in, hidden_size), jnp.float32, -s1, s1)
    b1 = jax.random.uniform(k2, (hidden_size,), jnp.float32, -s1, s1)
    w2 = jax.random.uniform(k3, (hidden_size, d_out), jnp.float32, -s2, s2)
    b2 = jax.random.uniform(k4, (d_out,), jnp.float32, -s2, s2)
    return w1, b1, w2, b2


if __name__ == "__main__":
    # small shapes consistent with the module's forward
    INPUT_H, INPUT_W = 16, 16          # -> flattened feature dim 256
    HIDDEN = 64
    LATENT = 8                         # -> output feature dim 16 (padded to 128)
    BATCH = 512                        # >= 2 grid steps at tb=256 (v7x megacore)

    key = jax.random.PRNGKey(0)
    kx, kp = jax.random.split(key)

    # NCHW-style input, like a MNIST-ish image batch
    x = jax.random.normal(kx, (BATCH, 1, INPUT_H, INPUT_W), jnp.float32)
    w1, b1, w2, b2 = init_encoder_params(kp, INPUT_H, INPUT_W, HIDDEN, LATENT)
    params = prepare_encoder_params(w1, b1, w2, b2, latent_size=LATENT)

    out = encoder_forward(x, params, input_h=INPUT_H, input_w=INPUT_W,
                          latent_size=LATENT, tb=256)
    out = jax.block_until_ready(out)

    # reference check in plain f32 JAX (same math); tolerance loosened because
    # inputs/weights are bf16 (accumulation stays f32).
    x2d = x.reshape(-1, INPUT_H * INPUT_W)
    ref = (jnp.maximum(x2d @ w1 + b1, 0.0) @ w2 + b2).reshape(-1, 2, LATENT)
    assert out.shape == (BATCH, 2, LATENT), out.shape
    max_err = float(jnp.max(jnp.abs(out - ref)))
    assert jnp.allclose(out, ref, atol=3e-2, rtol=3e-2), max_err

    print("KERNEL_OK")
</pallas_src>

<mosaic_0001>
module attributes {stable_mosaic.version = 11 : i64} {
  func.func @_encoder_kernel(%arg0: i32, %arg1: memref<256x256xbf16, #tpu.memory_space<vmem>>, %arg2: memref<256x64xbf16, #tpu.memory_space<vmem>>, %arg3: memref<1x64xf32, #tpu.memory_space<vmem>>, %arg4: memref<64x128xbf16, #tpu.memory_space<vmem>>, %arg5: memref<1x128xf32, #tpu.memory_space<vmem>>, %arg6: memref<256x128xf32, #tpu.memory_space<vmem>>) attributes {dimension_semantics = [#tpu.dimension_semantics<parallel>], iteration_bounds = array<i64: 2>, scalar_prefetch = 0 : i64, scratch_operands = 0 : i64, tpu.core_type = #tpu.core_type<tc>, window_params = [{transform_indices = @transform_0, window_bounds = array<i64: 256, 256>}, {pipeline_mode = #tpu.pipeline_mode<synchronous>, transform_indices = @transform_1, window_bounds = array<i64: 256, 64>}, {pipeline_mode = #tpu.pipeline_mode<synchronous>, transform_indices = @transform_2, window_bounds = array<i64: 1, 64>}, {pipeline_mode = #tpu.pipeline_mode<synchronous>, transform_indices = @transform_3, window_bounds = array<i64: 64, 128>}, {pipeline_mode = #tpu.pipeline_mode<synchronous>, transform_indices = @transform_4, window_bounds = array<i64: 1, 128>}, {transform_indices = @transform_5, window_bounds = array<i64: 256, 128>}]} {
    %c0 = arith.constant 0 : index
    %c0_0 = arith.constant 0 : index
    %0 = vector.load %arg1[%c0, %c0_0] : memref<256x256xbf16, #tpu.memory_space<vmem>>, vector<256x256xbf16>
    %c0_1 = arith.constant 0 : index
    %c0_2 = arith.constant 0 : index
    %1 = vector.load %arg2[%c0_1, %c0_2] : memref<256x64xbf16, #tpu.memory_space<vmem>>, vector<256x64xbf16>
    %cst = arith.constant dense<0.000000e+00> : vector<256x64xf32>
    %2 = tpu.matmul %0, %1, %cst {dimension_numbers = #tpu.dot_dimension_numbers<[1], [0], [0], [1], [0, 0, 1, 1], [], []>} : vector<256x256xbf16>, vector<256x64xbf16>, vector<256x64xf32> -> vector<256x64xf32>
    %c0_3 = arith.constant 0 : index
    %c0_4 = arith.constant 0 : index
    %3 = vector.load %arg3[%c0_3, %c0_4] : memref<1x64xf32, #tpu.memory_space<vmem>>, vector<1x64xf32>
    %4 = vector.broadcast %3 : vector<1x64xf32> to vector<256x64xf32>
    %5 = arith.addf %2, %4 : vector<256x64xf32>
    %cst_5 = arith.constant 0.000000e+00 : f32
    %6 = vector.broadcast %cst_5 : f32 to vector<256x64xf32>
    %7 = arith.maximumf %5, %6 : vector<256x64xf32>
    %8 = arith.truncf %7 : vector<256x64xf32> to vector<256x64xbf16>
    %c0_6 = arith.constant 0 : index
    %c0_7 = arith.constant 0 : index
    %9 = vector.load %arg4[%c0_6, %c0_7] : memref<64x128xbf16, #tpu.memory_space<vmem>>, vector<64x128xbf16>
    %cst_8 = arith.constant dense<0.000000e+00> : vector<256x128xf32>
    %10 = tpu.matmul %8, %9, %cst_8 {dimension_numbers = #tpu.dot_dimension_numbers<[1], [0], [0], [1], [0, 0, 1, 1], [], []>} : vector<256x64xbf16>, vector<64x128xbf16>, vector<256x128xf32> -> vector<256x128xf32>
    %c0_9 = arith.constant 0 : index
    %c0_10 = arith.constant 0 : index
    %11 = vector.load %arg5[%c0_9, %c0_10] : memref<1x128xf32, #tpu.memory_space<vmem>>, vector<1x128xf32>
    %12 = vector.broadcast %11 : vector<1x128xf32> to vector<256x128xf32>
    %13 = arith.addf %10, %12 : vector<256x128xf32>
    %c0_11 = arith.constant 0 : index
    %c0_12 = arith.constant 0 : index
    %14 = vector.load %arg6[%c0_11, %c0_12] : memref<256x128xf32, #tpu.memory_space<vmem>>, vector<256x128xf32>
    tpu.vector_store %arg6[%c0_11, %c0_12], %13 {strides = array<i32>} : memref<256x128xf32, #tpu.memory_space<vmem>>, vector<256x128xf32>,
    return
  }
  func.func @transform_0(%arg0: i32) -> (i32, i32) {
    %c0_i32 = arith.constant 0 : i32
    %c0_i32_0 = arith.constant 0 : i32
    return %arg0, %c0_i32 : i32, i32
  }
  func.func @transform_1(%arg0: i32) -> (i32, i32) {
    %c0_i32 = arith.constant 0 : i32
    %c0_i32_0 = arith.constant 0 : i32
    %c0_i32_1 = arith.constant 0 : i32
    return %c0_i32, %c0_i32_0 : i32, i32
  }
  func.func @transform_2(%arg0: i32) -> (i32, i32) {
    %c0_i32 = arith.constant 0 : i32
    %c0_i32_0 = arith.constant 0 : i32
    %c0_i32_1 = arith.constant 0 : i32
    return %c0_i32, %c0_i32_0 : i32, i32
  }
  func.func @transform_3(%arg0: i32) -> (i32, i32) {
    %c0_i32 = arith.constant 0 : i32
    %c0_i32_0 = arith.constant 0 : i32
    %c0_i32_1 = arith.constant 0 : i32
    return %c0_i32, %c0_i32_0 : i32, i32
  }
  func.func @transform_4(%arg0: i32) -> (i32, i32) {
    %c0_i32 = arith.constant 0 : i32
    %c0_i32_0 = arith.constant 0 : i32
    %c0_i32_1 = arith.constant 0 : i32
    return %c0_i32, %c0_i32_0 : i32, i32
  }
  func.func @transform_5(%arg0: i32) -> (i32, i32) {
    %c0_i32 = arith.constant 0 : i32
    %c0_i32_0 = arith.constant 0 : i32
    return %arg0, %c0_i32 : i32, i32
  }
}

module attributes {stable_mosaic.version = 11 : i64} {
  func.func @_encoder_kernel(%arg0: i32, %arg1: memref<256x256xbf16, #tpu.memory_space<vmem>>, %arg2: memref<256x64xbf16, #tpu.memory_space<vmem>>, %arg3: memref<1x64xf32, #tpu.memory_space<vmem>>, %arg4: memref<64x128xbf16, #tpu.memory_space<vmem>>, %arg5: memref<1x128xf32, #tpu.memory_space<vmem>>, %arg6: memref<256x128xf32, #tpu.memory_space<vmem>>) attributes {dimension_semantics = [#tpu.dimension_semantics<parallel>], iteration_bounds = array<i64: 2>, scalar_prefetch = 0 : i64, scratch_operands = 0 : i64, tpu.core_type = #tpu.core_type<tc>, window_params = [{transform_indices = @transform_0, window_bounds = array<i64: 256, 256>}, {pipeline_mode = #tpu.pipeline_mode<synchronous>, transform_indices = @transform_1, window_bounds = array<i64: 256, 64>}, {pipeline_mode = #tpu.pipeline_mode<synchronous>, transform_indices = @transform_2, window_bounds = array<i64: 1, 64>}, {pipeline_mode = #tpu.pipeline_mode<synchronous>, transform_indices = @transform_3, window_bounds = array<i64: 64, 128>}, {pipeline_mode = #tpu.pipeline_mode<synchronous>, transform_indices = @transform_4, window_bounds = array<i64: 1, 128>}, {transform_indices = @transform_5, window_bounds = array<i64: 256, 128>}]} {
    %c0 = arith.constant 0 : index
    %c0_0 = arith.constant 0 : index
    %0 = vector.load %arg1[%c0, %c0_0] : memref<256x256xbf16, #tpu.memory_space<vmem>>, vector<256x256xbf16>
    %c0_1 = arith.constant 0 : index
    %c0_2 = arith.constant 0 : index
    %1 = vector.load %arg2[%c0_1, %c0_2] : memref<256x64xbf16, #tpu.memory_space<vmem>>, vector<256x64xbf16>
    %cst = arith.constant dense<0.000000e+00> : vector<256x64xf32>
    %2 = tpu.matmul %0, %1, %cst {dimension_numbers = #tpu.dot_dimension_numbers<[1], [0], [0], [1], [0, 0, 1, 1], [], []>} : vector<256x256xbf16>, vector<256x64xbf16>, vector<256x64xf32> -> vector<256x64xf32>
    %c0_3 = arith.constant 0 : index
    %c0_4 = arith.constant 0 : index
    %3 = vector.load %arg3[%c0_3, %c0_4] : memref<1x64xf32, #tpu.memory_space<vmem>>, vector<1x64xf32>
    %4 = vector.broadcast %3 : vector<1x64xf32> to vector<256x64xf32>
    %5 = arith.addf %2, %4 : vector<256x64xf32>
    %cst_5 = arith.constant 0.000000e+00 : f32
    %6 = vector.broadcast %cst_5 : f32 to vector<256x64xf32>
    %7 = arith.maximumf %5, %6 : vector<256x64xf32>
    %8 = arith.truncf %7 : vector<256x64xf32> to vector<256x64xbf16>
    %c0_6 = arith.constant 0 : index
    %c0_7 = arith.constant 0 : index
    %9 = vector.load %arg4[%c0_6, %c0_7] : memref<64x128xbf16, #tpu.memory_space<vmem>>, vector<64x128xbf16>
    %cst_8 = arith.constant dense<0.000000e+00> : vector<256x128xf32>
    %10 = tpu.matmul %8, %9, %cst_8 {dimension_numbers = #tpu.dot_dimension_numbers<[1], [0], [0], [1], [0, 0, 1, 1], [], []>} : vector<256x64xbf16>, vector<64x128xbf16>, vector<256x128xf32> -> vector<256x128xf32>
    %c0_9 = arith.constant 0 : index
    %c0_10 = arith.constant 0 : index
    %11 = vector.load %arg5[%c0_9, %c0_10] : memref<1x128xf32, #tpu.memory_space<vmem>>, vector<1x128xf32>
    %12 = vector.broadcast %11 : vector<1x128xf32> to vector<256x128xf32>
    %13 = arith.addf %10, %12 : vector<256x128xf32>
    %c0_11 = arith.constant 0 : index
    %c0_12 = arith.constant 0 : index
    %14 = vector.load %arg6[%c0_11, %c0_12] : memref<256x128xf32, #tpu.memory_space<vmem>>, vector<256x128xf32>
    tpu.vector_store %arg6[%c0_11, %c0_12], %13 {strides = array<i32>} : memref<256x128xf32, #tpu.memory_space<vmem>>, vector<256x128xf32>,
    return
  }
  func.func @transform_0(%arg0: i32) -> (i32, i32) {
    %c0_i32 = arith.constant 0 : i32
    %c0_i32_0 = arith.constant 0 : i32
    return %arg0, %c0_i32 : i32, i32
  }
  func.func @transform_1(%arg0: i32) -> (i32, i32) {
    %c0_i32 = arith.constant 0 : i32
    %c0_i32_0 = arith.constant 0 : i32
    %c0_i32_1 = arith.constant 0 : i32
    return %c0_i32, %c0_i32_0 : i32, i32
  }
  func.func @transform_2(%arg0: i32) -> (i32, i32) {
    %c0_i32 = arith.constant 0 : i32
    %c0_i32_0 = arith.constant 0 : i32
    %c0_i32_1 = arith.constant 0 : i32
    return %c0_i32, %c0_i32_0 : i32, i32
  }
  func.func @transform_3(%arg0: i32) -> (i32, i32) {
    %c0_i32 = arith.constant 0 : i32
    %c0_i32_0 = arith.constant 0 : i32
    %c0_i32_1 = arith.constant 0 : i32
    return %c0_i32, %c0_i32_0 : i32, i32
  }
  func.func @transform_4(%arg0: i32) -> (i32, i32) {
    %c0_i32 = arith.constant 0 : i32
    %c0_i32_0 = arith.constant 0 : i32
    %c0_i32_1 = arith.constant 0 : i32
    return %c0_i32, %c0_i32_0 : i32, i32
  }
  func.func @transform_5(%arg0: i32) -> (i32, i32) {
    %c0_i32 = arith.constant 0 : i32
    %c0_i32_0 = arith.constant 0 : i32
    return %arg0, %c0_i32 : i32, i32
  }
}

</mosaic_0001>

<bundles_post_ra>
// kernel: _pallas_encoder.1
= control target key start
LH: loop header
LB: loop body
LE: loop exit
PB: predicated region body
PF: predicated region fallthrough
CT: control target
= control target key end

     0   :  { %10 = vsyncpa [#allocation3], 0  ;;  %s2076_s0 = inlined_call_operand.hbm [shape: bf16[512,256], index: 0, kind: input, shape index: {}]   ;;  %s2077_s1 = inlined_call_operand.vmem [shape: bf16[256,64], index: 1, kind: input, shape index: {}]   ;;  %s2078_s2 = inlined_call_operand.vmem [shape: f32[1,64], index: 2, kind: input, shape index: {}]   ;;  %s2079_s3 = inlined_call_operand.vmem [shape: bf16[64,128], index: 3, kind: input, shape index: {}]   ;;  %s2080_s4 = inlined_call_operand.vmem [shape: f32[1,128], index: 4, kind: input, shape index: {}]   ;;  %s2081_s5 = inlined_call_operand.hbm [shape: f32[512,128], index: 5, kind: output, shape index: {}]  }
   0x1   :  { %12 = vsyncpa [#allocation3 + $0x1], 0 }
   0x2   :  { %13 = vsyncpa [#allocation4], 0 }
   0x3   :  { %15 = vsyncpa [#allocation4 + $0x1], 0  ;;  %s1679_s18 = smov 0   ;;  %s1681_s19 = smov 0  }
   0x4   :  { %s1683_s20 = smov 0   ;;  %s1685_s21 = smov 0  }
   0x5 LB: > { %s1700_s22 = sadd.s32 4294967295, %s1641_s21   ;;  %s1151_s23 = sadd.s32 4294967294, %s1641_s21   ;;  %s1641_s21 = sphi %s1685_s21, %s2094_s21   ;;  %s1637_s20 = sphi %s1683_s20, %s2093_s20   ;;  %s1633_s19 = sphi %s1681_s19, %s2092_s19   ;;  %s1629_s18 = sphi %s1679_s18, %s2091_s18  }
   0x6   : > { %s1704_s24 = sadd.s32 1, %s1641_s21   ;;  %s28_s25 = sadd.s32 1, %s1637_s20 }
   0x7   : > { %s25_s26 = ssub.s32 %s1641_s21, %s1704_s24  ;;  %p35_p0 = scmp.ne.s32.totalorder %s1637_s20, %s1633_s19 }
   0x8   : > { %p26_p1 = scmp.eq.s32.totalorder %s25_s26, 0  ;;  %p36_p2 = scmp.eq.s32.totalorder %s1641_s21, 0 }
   0x9   : > { %p41_p3 = scmp.ne.s32.totalorder %s1633_s19, %s1629_s18  ;;  %p42_p4 = scmp.eq.s32.totalorder %s1700_s22, 0 }
   0xa   : > { %s1716_s27 = scalar_select %p26_p1, %s1637_s20, %s28_s25  }
   0xb   : > { %p1718_p5 = por %p36_p2, %p35_p0  ;;  %p1722_p6 = por %p42_p4, %p41_p3 }
   0xc   : > { %p149_p7 = scmp.eq.s32.totalorder %s1700_s22, 1  ;;  %p155_p8 = scmp.eq.s32.totalorder %s1151_s23, 1 }
   0xd   : > { %p1439_p10 = scmp.lt.s32.totalorder %s1641_s21, 2  ;;  %s187_s7 = sand.u32 1, %s1637_s20  }
   0xe   : > { %p1729_p11 = por %p149_p7, %p35_p0  ;;  %p1733_p12 = por %p155_p8, %p41_p3 }
   0xf   : > { %s1237_s8 = sshll.u32 %s1641_s21, 12  ;;  %s1154_s9 = sshll.u32 %s187_s7, 8 }
  0x10   : > { %s2085_s30 = scalar_select %p1729_p11, 1, 0 }
  0x11   : > { %s2086_s6 = scalar_select %p1733_p12, 1, 0 }
  0x12   : > { %s1742_s12 = scalar_lea.hbm %s2076_s0, %s1237_s8  ;;  %s191_s13 = scalar_lea.vmem [#allocation2], %s1154_s9 }
  0x13   : > { %s199_s14 = sshll.u32 %s191_s13, 4  ;;  %p1746_p13 = pnand %p1439_p10, %p1718_p5  ;;  %s1750_s14 = int_to_ptr.vmem [resolvable:$true] %s199_s14 }
  0x14   : > { %s1752_s16 = scalar_lea.sflag [#allocation3], %s187_s7  ;;  %s1545_s17 = scalar_lea.hbm %s1742_s12, 4096 }
  0x15   : > { %p1546_p0 = scmp.ne.s32.totalorder %s1742_s12, %s1545_s17  ;;  %p1547_p1 = pneg %p1746_p13 }
  0x16   : > { %s1550_s26 = scalar_lea.hbm %s2076_s0, 8192  ;;  %p1551_p4 = scmp.lt.u32.totalorder %s1742_s12, %s2076_s0 }
  0x17   : > { %p1548_p2 = pnand %p1547_p1, %p1546_p0  ;;  %p1552_p5 = scmp.lt.u32.totalorder %s1550_s26, %s1545_s17 }
  0x18   : > { %p1554_p8 = scmp.lt.u32.totalorder %s1545_s17, %s1742_s12 }
  0x19   : > { %p1549_p3 = pneg %p1548_p2  ;;  %p1553_p7 = por %p1552_p5, %p1551_p4 }
  0x1b   : > { %p1555_p10 = por %p1554_p8, %p1553_p7 }
  0x1d   : > { %p1556_p9 = pnand %p1555_p10, %p1549_p3 }
  0x1f   : > { %1559 = shalt.err (!%p1556_p9)
}
  0x20   : > { %s1560_s7 = scalar_lea.vmem %s1750_s14, 4096  ;;  %s1643_s9 = smov [#allocation2]  }
  0x21   : > { %p1561_p0 = scmp.ne.s32.totalorder %s1750_s14, %s1560_s7  ;;  %s1565_s10 = sshll.u32 %s1643_s9, 4  ;;  %s1566_s10 = int_to_ptr.vmem [resolvable:$false] %s1565_s10 }
  0x22   : > { %s1567_s11 = scalar_lea.vmem %s1566_s10, 8192  ;;  %p1568_p11 = scmp.lt.s32.totalorder %s1750_s14, %s1566_s10 }
  0x23   : > { %p1563_p2 = pnand %p1561_p0, %p1547_p1  ;;  %p1569_p4 = scmp.lt.s32.totalorder %s1567_s11, %s1560_s7 }
  0x25   : > { %p1564_p12 = pneg %p1563_p2  ;;  %p1570_p5 = por %p1569_p4, %p1568_p11 }
  0x27   : > { %p1571_p7 = pnand %p1570_p5, %p1564_p12 }
  0x29   : > { %1574 = shalt.err (!%p1571_p7)
}
  0x2a   : > { %s1644_s13 = smov 128   ;;  %s1645_s17 = smov 8  }
  0x2b   : > { %1434 = dma.hbm_to_vmem [thread:$0]  (!%p1746_p13), %s1742_s12, 4096, %s1750_s14, %s1752_s16, %s1644_s13, %s1644_s13, %s1645_s17  }
  0x2c   : > { %p1158_p9 = scmp.ge.s32.totalorder %s1641_s21, 1  ;;  %p207_p1 = scmp.lt.s32.totalorder %s1641_s21, 3 }
  0x2e   : > { %p208_p3 = pnand %p1158_p9, %p207_p1 }
  0x2f   : > { %s1783_s23 = sand.u32 (!%p208_p3), 1, %s1633_s19  }
  0x30   : > { %211 = sbr.rel (%p208_p3) target bundleno = 648 (0x288), region = 40  ;;  %s1159_s25 = sshll.u32 (!%p208_p3), %s1783_s23, 8 }
  0x31   : > { %s214_s26 = scalar_lea.sflag (!%p208_p3), [#allocation3], %s1783_s23  ;;  %s1789_s28 = scalar_lea.vmem (!%p208_p3), [#allocation2], %s1159_s25 }
  0x37   : > { %1620 = dma.done.wait (%p1722_p6), %s214_s26, 4096  }
  0x38   : > { %1622 = vsyncadd (%p1722_p6), %s214_s26, 4294963200  ;;  %v1477_v0 = vld [vmem:[%s2077_s1 + $0x40] sm:$0xff]   ;;  %v1479_v2 = vld [vmem:[%s2077_s1 + $0x48] sm:$0xff]   ;;  %vm822_vm0 = vcmask 523264   ;;  %s1961_s8 = scalar_lea.vmem [#allocation5], %s1159_s25  ;;  %s1238_s25 = sshll.u32 %s1700_s22, 12 }
  0x39   : > { %v1478_v1 = vld [vmem:[%s2077_s1] sm:$0xff]   ;;  %1239 = vmatprep.subr.bf16.mxu0 %v1477_v0  ;;  %1411 = vmatprep.subr.bf16.mxu1 %v1477_v0  ;;  %v1480_v3 = vld [vmem:[%s2077_s1 + $0x8] sm:$0xff]   ;;  %v1481_v4 = vld [vmem:[%s2077_s1 + $0x50] sm:$0xff]   ;;  %s1078_s7 = sshll.u32 %s1961_s8, 4  ;;  %s2026_s29 = scalar_lea.hbm %s2081_s5, %s1238_s25  ;;  %s2028_s7 = int_to_ptr.vmem [resolvable:$true] %s1078_s7 }
  0x3a   : > { %1240 = vmatpush3.bf16.msra.mxu0 %v1478_v1  ;;  %1419 = vmatpush3.bf16.msra.mxu1 %v1478_v1  ;;  %v1482_v5 = vld [vmem:[%s2077_s1 + $0x10] sm:$0xff]   ;;  %v1483_v6 = vld [vmem:[%s2077_s1 + $0x58] sm:$0xff]   ;;  %v1485_v8 = vld [vmem:[%s2077_s1 + $0x60] sm:$0xff]   ;;  %s1065_s22 = scalar_lea.sflag [#allocation4], %s1783_s23  ;;  %s1575_s11 = scalar_lea.vmem %s2028_s7, 4096 }
  0x3b   : > { %1241 = vmatprep.subr.bf16.mxu0 %v1479_v2  ;;  %1412 = vmatprep.subr.bf16.mxu1 %v1479_v2  ;;  %v1484_v7 = vld [vmem:[%s2077_s1 + $0x18] sm:$0xff]   ;;  %v1486_v9 = vld [vmem:[%s2077_s1 + $0x20] sm:$0xff]   ;;  %v1487_v10 = vld [vmem:[%s2077_s1 + $0x68] sm:$0xff]   ;;  %p1576_p6 = scmp.ne.s32.totalorder %s2028_s7, %s1575_s11  ;;  %p2088_p11 = scmp.ne.s32.totalorder %s2085_s30, 0 }
  0x3c   : > { %v1495_v11 = vld [vmem:[%s1789_s28 + $0x4] ss:$8 sps:$4 sm:$0xff]   ;;  %v1489_v13 = vld [vmem:[%s2077_s1 + $0x70] sm:$0xff]   ;;  %v1491_v15 = vld [vmem:[%s2077_s1 + $0x78] sm:$0xff]   ;;  %s1646_s13 = smov [#allocation5]  }
  0x3d   : > { %v1488_v12 = vld [vmem:[%s2077_s1 + $0x28] sm:$0xff]   ;;  %606 = vmatprep.mubr.bf16.mxu0 %v1495_v11  ;;  %v1490_v14 = vld [vmem:[%s2077_s1 + $0x30] sm:$0xff]   ;;  %v1492_v16 = vld [vmem:[%s2077_s1 + $0x38] sm:$0xff]   ;;  %p1577_p12 = pnand %p1576_p6, %p2088_p11  ;;  %s1579_s17 = sshll.u32 %s1646_s13, 4  ;;  %s1580_s17 = int_to_ptr.vmem [resolvable:$false] %s1579_s17 }
  0x3e   : > { %1242 = vmatpush3.bf16.msra.mxu0 %v1480_v3  ;;  %1420 = vmatpush3.bf16.msra.mxu1 %v1480_v3  ;;  %v1493_v17 = vld [vmem:[%s1789_s28] ss:$8 sps:$4 sm:$0xff]   ;;  %v1525_v18 = vld [vmem:[%s1789_s28 + $0xc4] ss:$8 sps:$4 sm:$0xff]   ;;  %v1496_v19 = vld [vmem:[%s1789_s28 + $0x14] ss:$8 sps:$4 sm:$0xff]   ;;  %p1582_p8 = scmp.lt.s32.totalorder %s2028_s7, %s1580_s17 }
  0x3f   : > { %1243 = vmatprep.subr.bf16.mxu0 %v1481_v4  ;;  %1413 = vmatprep.subr.bf16.mxu1 %v1481_v4  ;;  %v1523_v20 = vld [vmem:[%s1789_s28 + $0xc0] ss:$8 sps:$4 sm:$0xff]   ;;  %v1529_v21 = vld [vmem:[%s1789_s28 + $0xd4] ss:$8 sps:$4 sm:$0xff]   ;;  %v1498_v22 = vld [vmem:[%s1789_s28 + $0x10] ss:$8 sps:$4 sm:$0xff]   ;;  %p1578_p13 = pneg %p1577_p12 }
  0x40   : > { %702 = vmatprep.mubr.bf16.mxu1 %v1525_v18  ;;  %v1499_v23 = vld [vmem:[%s1789_s28 + $0x24] ss:$8 sps:$4 sm:$0xff]   ;;  %v1531_v24 = vld [vmem:[%s1789_s28 + $0xd0] ss:$8 sps:$4 sm:$0xff]   ;;  %v1501_v26 = vld [vmem:[%s1789_s28 + $0x20] ss:$8 sps:$4 sm:$0xff]  }
  0x41   : > { %v1535_v25 = vld [vmem:[%s1789_s28 + $0xe4] ss:$8 sps:$4 sm:$0xff]   ;;  %v1502_v27 = vld [vmem:[%s1789_s28 + $0x34] ss:$8 sps:$4 sm:$0xff]   ;;  %v1537_v28 = vld [vmem:[%s1789_s28 + $0xe0] ss:$8 sps:$4 sm:$0xff]  }
  0x42   : > { %1244 = vmatpush3.bf16.msra.mxu0 %v1482_v5  ;;  %1421 = vmatpush3.bf16.msra.mxu1 %v1482_v5  ;;  %v1538_v29 = vld [vmem:[%s1789_s28 + $0xf4] ss:$8 sps:$4 sm:$0xff]   ;;  %v1504_v30 = vld [vmem:[%s1789_s28 + $0x30] ss:$8 sps:$4 sm:$0xff]   ;;  %v1505_v31 = vld [vmem:[%s1789_s28 + $0x44] ss:$8 sps:$4 sm:$0xff]  }
  0x43   : > { %1245 = vmatprep.subr.bf16.mxu0 %v1483_v6  ;;  %1414 = vmatprep.subr.bf16.mxu1 %v1483_v6  ;;  %v1540_v32 = vld [vmem:[%s1789_s28 + $0xf0] ss:$8 sps:$4 sm:$0xff]   ;;  %v1507_v33 = vld [vmem:[%s1789_s28 + $0x40] ss:$8 sps:$4 sm:$0xff]   ;;  %v1508_v34 = vld [vmem:[%s1789_s28 + $0x54] ss:$8 sps:$4 sm:$0xff]  }
  0x44   : > { %v1510_v35 = vld [vmem:[%s1789_s28 + $0x50] ss:$8 sps:$4 sm:$0xff]   ;;  %v1511_v36 = vld [vmem:[%s1789_s28 + $0x64] ss:$8 sps:$4 sm:$0xff]   ;;  %v1513_v37 = vld [vmem:[%s1789_s28 + $0x60] ss:$8 sps:$4 sm:$0xff]  }
  0x45   : > { %v1514_v38 = vld [vmem:[%s1789_s28 + $0x74] ss:$8 sps:$4 sm:$0xff]   ;;  %v1516_v39 = vld [vmem:[%s1789_s28 + $0x70] ss:$8 sps:$4 sm:$0xff]   ;;  %v1517_v40 = vld [vmem:[%s1789_s28 + $0x84] ss:$8 sps:$4 sm:$0xff]  }
  0x46   : > { %1246 = vmatpush3.bf16.msra.mxu0 %v1484_v7  ;;  %1422 = vmatpush3.bf16.msra.mxu1 %v1484_v7  ;;  %v1519_v41 = vld [vmem:[%s1789_s28 + $0x80] ss:$8 sps:$4 sm:$0xff]   ;;  %v1520_v42 = vld [vmem:[%s1789_s28 + $0x94] ss:$8 sps:$4 sm:$0xff]   ;;  %v1522_v43 = vld [vmem:[%s1789_s28 + $0x90] ss:$8 sps:$4 sm:$0xff]  }
  0x47   : > { %1247 = vmatprep.subr.bf16.mxu0 %v1485_v8  ;;  %1415 = vmatprep.subr.bf16.mxu1 %v1485_v8  ;;  %v1526_v44 = vld [vmem:[%s1789_s28 + $0xa4] ss:$8 sps:$4 sm:$0xff]   ;;  %v1528_v45 = vld [vmem:[%s1789_s28 + $0xa0] ss:$8 sps:$4 sm:$0xff]   ;;  %v1532_v46 = vld [vmem:[%s1789_s28 + $0xb4] ss:$8 sps:$4 sm:$0xff]  }
  0x48   : > { %v1534_v47 = vld [vmem:[%s1789_s28 + $0xb0] ss:$8 sps:$4 sm:$0xff]   ;;  %v1541_v48 = vld [vmem:[%s2079_s3] sm:$0xff]   ;;  %v1542_v49 = vld [vmem:[%s2079_s3 + $0x8] sm:$0xff]   ;;  %s1581_s28 = scalar_lea.vmem %s1580_s17, 8192 }
  0x49   : > { %v1543_v50 = vld [vmem:[%s2079_s3 + $0x10] sm:$0xff]   ;;  %v1544_v51 = vld [vmem:[%s2079_s3 + $0x18] sm:$0xff]   ;;  %v1890_v53 = vld [vmem:[%s2078_s2] ss:$0 sm:$0xff]  ;;  %p1583_p10 = scmp.lt.s32.totalorder %s1581_s28, %s1575_s11 }
  0x4a   : > { %1248 = vmatpush3.bf16.msra.mxu0 %v1486_v9  ;;  %1423 = vmatpush3.bf16.msra.mxu1 %v1486_v9 }
  0x4b   : > { %1249 = vmatprep.subr.bf16.mxu0 %v1487_v10  ;;  %1416 = vmatprep.subr.bf16.mxu1 %v1487_v10  ;;  %p1584_p0 = por %p1583_p10, %p1582_p8 }
  0x4d   : > { %p1585_p2 = pnand %p1584_p0, %p1578_p13 }
  0x4e   : > { %1250 = vmatpush3.bf16.msra.mxu0 %v1488_v12  ;;  %1424 = vmatpush3.bf16.msra.mxu1 %v1488_v12 }
  0x4f   : > { %1251 = vmatprep.subr.bf16.mxu0 %v1489_v13  ;;  %1417 = vmatprep.subr.bf16.mxu1 %v1489_v13 }
  0x52   : > { %1252 = vmatpush3.bf16.msra.mxu0 %v1490_v14  ;;  %1425 = vmatpush3.bf16.msra.mxu1 %v1490_v14 }
  0x53   : > { %1253 = vmatprep.subr.bf16.mxu0 %v1491_v15  ;;  %1418 = vmatprep.subr.bf16.mxu1 %v1491_v15 }
  0x56   : > { %1254 = vmatpush3.bf16.msra.mxu0 %v1492_v16  ;;  %1426 = vmatpush3.bf16.msra.mxu1 %v1492_v16 }
  0x57   : > { %1371 = vmatprep.subr.bf16.mxu1 %v1541_v48 }
  0x59   : > { %607 = vmatmul.mubr.bf16.vlgmr.msra.gmra.mrb[0].mxu0 %v1493_v17  ;;  %703 = vmatmul.mubr.bf16.vlgmr.msra.gmra.mrb[0].mxu1 %v1523_v20 }
  0x5a   : > { %614 = vmatprep.mubr.bf16.mxu0 %v1496_v19  ;;  %710 = vmatprep.mubr.bf16.mxu1 %v1529_v21 }
  0x5b   : > { %1372 = vmatpush3.bf16.msra.mxu1 %v1541_v48 }
  0x5c   : > { %1373 = vmatprep.subr.bf16.mxu1 %v1542_v49 }
  0x5f   : > { %1374 = vmatpush3.bf16.msra.mxu1 %v1542_v49 }
  0x60   : > { %1375 = vmatprep.subr.bf16.mxu1 %v1543_v50 }
  0x61   : > { %615 = vmatmul.mubr.bf16.gmra.mrb[4].mxu0 %v1498_v22  ;;  %711 = vmatmul.mubr.bf16.gmra.mrb[4].mxu1 %v1531_v24 }
  0x62   : > { %622 = vmatprep.mubr.bf16.mxu0 %v1499_v23  ;;  %718 = vmatprep.mubr.bf16.mxu1 %v1535_v25 }
  0x63   : > { %1376 = vmatpush3.bf16.msra.mxu1 %v1543_v50 }
  0x64   : > { %1377 = vmatprep.subr.bf16.mxu1 %v1544_v51 }
  0x67   : > { %1378 = vmatpush3.bf16.msra.mxu1 %v1544_v51 }
  0x69   : > { %623 = vmatmul.mubr.bf16.gmra.mrb[8].mxu0 %v1501_v26  ;;  %719 = vmatmul.mubr.bf16.gmra.mrb[8].mxu1 %v1537_v28 }
  0x6a   : > { %630 = vmatprep.mubr.bf16.mxu0 %v1502_v27  ;;  %726 = vmatprep.mubr.bf16.mxu1 %v1538_v29 }
  0x71   : > { %631 = vmatmul.mubr.bf16.gmra.mrb[12].mxu0 %v1504_v30  ;;  %727 = vmatmul.mubr.bf16.gmra.mrb[12].mxu1 %v1540_v32 }
  0x72   : > { %638 = vmatprep.mubr.bf16.mxu0 %v1505_v31 }
  0x79   : > { %639 = vmatmul.mubr.bf16.gmra.mrb[16].mxu0 %v1507_v33 }
  0x7a   : > { %646 = vmatprep.mubr.bf16.mxu0 %v1508_v34 }
  0x81   : > { %647 = vmatmul.mubr.bf16.gmra.mrb[20].mxu0 %v1510_v35 }
  0x82   : > { %654 = vmatprep.mubr.bf16.mxu0 %v1511_v36 }
  0x89   : > { %655 = vmatmul.mubr.bf16.gmra.mrb[24].mxu0 %v1513_v37 }
  0x8a   : > { %662 = vmatprep.mubr.bf16.mxu0 %v1514_v38 }
  0x91   : > { %663 = vmatmul.mubr.bf16.gmra.mrb[28].mxu0 %v1516_v39 }
  0x92   : > { %670 = vmatprep.mubr.bf16.mxu0 %v1517_v40 }
  0x99   : > { %671 = vmatmul.mubr.bf16.gmra.mrb[32].mxu0 %v1519_v41 }
  0x9a   : > { %678 = vmatprep.mubr.bf16.mxu0 %v1520_v42 }
  0xa1   : > { %679 = vmatmul.mubr.bf16.gmra.mrb[36].mxu0 %v1522_v43 }
  0xa2   : > { %686 = vmatprep.mubr.bf16.mxu0 %v1526_v44 }
  0xa9   : > { %687 = vmatmul.mubr.bf16.gmra.mrb[40].mxu0 %v1528_v45 }
  0xaa   : > { %694 = vmatprep.mubr.bf16.mxu0 %v1532_v46 }
  0xb1   : > { %695 = vmatmul.mubr.bf16.gmra.mrb[44].mxu0 %v1534_v47 }
 0x12c   : > { %v1255_v52 = vpop.f32.mrb[0].mxu0  ;;  %v1327_v55 = vpop.f32.mrb[0].mxu1 }
 0x12d   : > { %v1256_v54 = vpop.f32.mrb[1].mxu0  ;;  %v1328_v58 = vpop.f32.mrb[1].mxu1 }
 0x12e   : > { %v1257_v56 = vadd.f32 %v1256_v54, %v1255_v52  ;;  %v1258_v57 = vpop.f32.mrb[2].mxu0  ;;  %v1329_v60 = vadd.f32 %v1328_v58, %v1327_v55  ;;  %v1330_v61 = vpop.f32.mrb[2].mxu1 }
 0x12f   : > { %v1259_v59 = vpop.f32.mrb[3].mxu0  ;;  %v1331_v0 = vpop.f32.mrb[3].mxu1 }
 0x130   : > { %v609_v62 = vadd.f32 %v1257_v56, %v1890_v53  ;;  %v1260_v63 = vadd.f32 %v1259_v59, %v1258_v57  ;;  %v705_v1 = vadd.f32 %v1329_v60, %v1890_v53  ;;  %v1332_v2 = vadd.f32 %v1331_v0, %v1330_v61 }
 0x132   : > { %v612_v3 = vadd.f32 %v1260_v63, %v1890_v53  ;;  %v759_v4 = vmax.f32 %v705_v1, 0.0  ;;  %v708_v5 = vadd.f32 %v1332_v2, %v1890_v53  ;;  %v735_v6 = vmax.f32 %v609_v62, 0.0 }
 0x134   : > { %v736_v7 = vmax.f32 %v612_v3, 0.0  ;;  %v1261_v8 = vpop.f32.mrb[4].mxu0  ;;  %v760_v10 = vmax.f32 %v708_v5, 0.0  ;;  %v1333_v11 = vpop.f32.mrb[4].mxu1 }
 0x135   : > { %v1262_v9 = vpop.f32.mrb[5].mxu0  ;;  %v1334_v15 = vpop.f32.mrb[5].mxu1 }
 0x136   : > { %v767_v12 = vpack.c.bf16 %v736_v7, %v735_v6  ;;  %v1263_v13 = vadd.f32 %v1262_v9, %v1261_v8  ;;  %v1264_v14 = vpop.f32.mrb[6].mxu0  ;;  %v1896_v17 = vpack.c.bf16 %v760_v10, %v759_v4  ;;  %v1335_v18 = vadd.f32 %v1334_v15, %v1333_v11  ;;  %v1336_v19 = vpop.f32.mrb[6].mxu1 }
 0x137   : > { %v1265_v16 = vpop.f32.mrb[7].mxu0  ;;  %v1337_v22 = vpop.f32.mrb[7].mxu1 }
 0x138   : > { %v617_v20 = vadd.f32 %v1263_v13, %v1890_v53  ;;  %v1266_v21 = vadd.f32 %v1265_v16, %v1264_v14  ;;  %1379 = vmatprep.mubr.msk.bf16.mxu1 %vm822_vm0, %v767_v12  ;;  %v713_v23 = vadd.f32 %v1335_v18, %v1890_v53  ;;  %v1338_v24 = vadd.f32 %v1337_v22, %v1336_v19 }
 0x13a   : > { %v620_v25 = vadd.f32 %v1266_v21, %v1890_v53  ;;  %v761_v26 = vmax.f32 %v713_v23, 0.0  ;;  %v716_v27 = vadd.f32 %v1338_v24, %v1890_v53  ;;  %v737_v28 = vmax.f32 %v617_v20, 0.0 }
 0x13c   : > { %v738_v29 = vmax.f32 %v620_v25, 0.0  ;;  %v1267_v30 = vpop.f32.mrb[8].mxu0  ;;  %v762_v32 = vmax.f32 %v716_v27, 0.0  ;;  %v1339_v33 = vpop.f32.mrb[8].mxu1 }
 0x13d   : > { %v1268_v31 = vpop.f32.mrb[9].mxu0  ;;  %v1340_v37 = vpop.f32.mrb[9].mxu1 }
 0x13e   : > { %v768_v34 = vpack.c.bf16 %v738_v29, %v737_v28  ;;  %v1269_v35 = vadd.f32 %v1268_v31, %v1267_v30  ;;  %v1270_v36 = vpop.f32.mrb[10].mxu0  ;;  %v1903_v39 = vpack.c.bf16 %v762_v32, %v761_v26  ;;  %v1341_v40 = vadd.f32 %v1340_v37, %v1339_v33  ;;  %v1342_v41 = vpop.f32.mrb[10].mxu1 }
 0x13f   : > { %v1271_v38 = vpop.f32.mrb[11].mxu0  ;;  %v1343_v44 = vpop.f32.mrb[11].mxu1 }
 0x140   : > { %v625_v42 = vadd.f32 %v1269_v35, %v1890_v53  ;;  %v1272_v43 = vadd.f32 %v1271_v38, %v1270_v36  ;;  %1380 = vmatmul.mubr.msk.bf16.vlgmr.msra.gmra.mrb[16].mxu1 %vm822_vm0, %v768_v34  ;;  %v721_v45 = vadd.f32 %v1341_v40, %v1890_v53  ;;  %v1344_v46 = vadd.f32 %v1343_v44, %v1342_v41 }
 0x142   : > { %v628_v47 = vadd.f32 %v1272_v43, %v1890_v53  ;;  %v763_v48 = vmax.f32 %v721_v45, 0.0  ;;  %v724_v49 = vadd.f32 %v1344_v46, %v1890_v53  ;;  %v739_v50 = vmax.f32 %v625_v42, 0.0 }
 0x144   : > { %v740_v51 = vmax.f32 %v628_v47, 0.0  ;;  %v1273_v52 = vpop.f32.mrb[12].mxu0  ;;  %v764_v55 = vmax.f32 %v724_v49, 0.0  ;;  %v1345_v56 = vpop.f32.mrb[12].mxu1 }
 0x145   : > { %v1274_v54 = vpop.f32.mrb[13].mxu0  ;;  %v1346_v60 = vpop.f32.mrb[13].mxu1 }
 0x146   : > { %v769_v57 = vpack.c.bf16 %v740_v51, %v739_v50  ;;  %v1275_v58 = vadd.f32 %v1274_v54, %v1273_v52  ;;  %v1276_v59 = vpop.f32.mrb[14].mxu0  ;;  %v1910_v62 = vpack.c.bf16 %v764_v55, %v763_v48  ;;  %v1347_v63 = vadd.f32 %v1346_v60, %v1345_v56  ;;  %v1348_v0 = vpop.f32.mrb[14].mxu1 }
 0x147   : > { %v1277_v61 = vpop.f32.mrb[15].mxu0  ;;  %v1349_v3 = vpop.f32.mrb[15].mxu1 }
 0x148   : > { %v633_v1 = vadd.f32 %v1275_v58, %v1890_v53  ;;  %v1278_v2 = vadd.f32 %v1277_v61, %v1276_v59  ;;  %1383 = vmatprep.mubr.msk.bf16.mxu1 %vm822_vm0, %v769_v57  ;;  %v729_v4 = vadd.f32 %v1347_v63, %v1890_v53  ;;  %v1350_v5 = vadd.f32 %v1349_v3, %v1348_v0 }
 0x14a   : > { %v636_v6 = vadd.f32 %v1278_v2, %v1890_v53  ;;  %v765_v7 = vmax.f32 %v729_v4, 0.0  ;;  %v732_v8 = vadd.f32 %v1350_v5, %v1890_v53  ;;  %v741_v9 = vmax.f32 %v633_v1, 0.0 }
 0x14c   : > { %v742_v10 = vmax.f32 %v636_v6, 0.0  ;;  %v1279_v11 = vpop.f32.mrb[16].mxu0  ;;  %v766_v13 = vmax.f32 %v732_v8, 0.0 }
 0x14d   : > { %v1280_v12 = vpop.f32.mrb[17].mxu0 }
 0x14e   : > { %v770_v14 = vpack.c.bf16 %v742_v10, %v741_v9  ;;  %v1281_v15 = vadd.f32 %v1280_v12, %v1279_v11  ;;  %v1282_v16 = vpop.f32.mrb[18].mxu0  ;;  %v1917_v19 = vpack.c.bf16 %v766_v13, %v765_v7 }
 0x14f   : > { %v1283_v18 = vpop.f32.mrb[19].mxu0 }
 0x150   : > { %v641_v20 = vadd.f32 %v1281_v15, %v1890_v53  ;;  %v1284_v21 = vadd.f32 %v1283_v18, %v1282_v16  ;;  %1384 = vmatmul.mubr.msk.bf16.gmra.mrb[20].mxu1 %vm822_vm0, %v770_v14 }
 0x152   : > { %v644_v22 = vadd.f32 %v1284_v21, %v1890_v53  ;;  %v743_v23 = vmax.f32 %v641_v20, 0.0 }
 0x154   : > { %v744_v24 = vmax.f32 %v644_v22, 0.0  ;;  %v1285_v25 = vpop.f32.mrb[20].mxu0 }
 0x155   : > { %v1286_v26 = vpop.f32.mrb[21].mxu0 }
 0x156   : > { %v771_v27 = vpack.c.bf16 %v744_v24, %v743_v23  ;;  %v1287_v28 = vadd.f32 %v1286_v26, %v1285_v25  ;;  %v1288_v29 = vpop.f32.mrb[22].mxu0 }
 0x157   : > { %v1289_v30 = vpop.f32.mrb[23].mxu0 }
 0x158   : > { %v649_v31 = vadd.f32 %v1287_v28, %v1890_v53  ;;  %v1290_v32 = vadd.f32 %v1289_v30, %v1288_v29  ;;  %1387 = vmatprep.mubr.msk.bf16.mxu1 %vm822_vm0, %v771_v27 }
 0x15a   : > { %v652_v33 = vadd.f32 %v1290_v32, %v1890_v53  ;;  %v745_v34 = vmax.f32 %v649_v31, 0.0 }
 0x15c   : > { %v746_v35 = vmax.f32 %v652_v33, 0.0  ;;  %v1291_v36 = vpop.f32.mrb[24].mxu0 }
 0x15d   : > { %v1292_v37 = vpop.f32.mrb[25].mxu0 }
 0x15e   : > { %v772_v38 = vpack.c.bf16 %v746_v35, %v745_v34  ;;  %v1293_v40 = vadd.f32 %v1292_v37, %v1291_v36  ;;  %v1294_v41 = vpop.f32.mrb[26].mxu0 }
 0x15f   : > { %v1295_v42 = vpop.f32.mrb[27].mxu0 }
 0x160   : > { %v657_v43 = vadd.f32 %v1293_v40, %v1890_v53  ;;  %v1296_v44 = vadd.f32 %v1295_v42, %v1294_v41  ;;  %1388 = vmatmul.mubr.msk.bf16.gmra.mrb[24].mxu1 %vm822_vm0, %v772_v38 }
 0x162   : > { %v660_v45 = vadd.f32 %v1296_v44, %v1890_v53  ;;  %v747_v46 = vmax.f32 %v657_v43, 0.0 }
 0x164   : > { %v748_v47 = vmax.f32 %v660_v45, 0.0  ;;  %v1297_v48 = vpop.f32.mrb[28].mxu0 }
 0x165   : > { %v1298_v49 = vpop.f32.mrb[29].mxu0 }
 0x166   : > { %v773_v50 = vpack.c.bf16 %v748_v47, %v747_v46  ;;  %v1299_v51 = vadd.f32 %v1298_v49, %v1297_v48  ;;  %v1300_v52 = vpop.f32.mrb[30].mxu0 }
 0x167   : > { %v1301_v54 = vpop.f32.mrb[31].mxu0 }
 0x168   : > { %v665_v55 = vadd.f32 %v1299_v51, %v1890_v53  ;;  %v1302_v56 = vadd.f32 %v1301_v54, %v1300_v52  ;;  %1391 = vmatprep.mubr.msk.bf16.mxu1 %vm822_vm0, %v773_v50 }
 0x16a   : > { %v668_v57 = vadd.f32 %v1302_v56, %v1890_v53  ;;  %v749_v58 = vmax.f32 %v665_v55, 0.0 }
 0x16c   : > { %v750_v59 = vmax.f32 %v668_v57, 0.0  ;;  %v1303_v60 = vpop.f32.mrb[32].mxu0 }
 0x16d   : > { %v1304_v61 = vpop.f32.mrb[33].mxu0 }
 0x16e   : > { %v774_v63 = vpack.c.bf16 %v750_v59, %v749_v58  ;;  %v1305_v0 = vadd.f32 %v1304_v61, %v1303_v60  ;;  %v1306_v1 = vpop.f32.mrb[34].mxu0 }
 0x16f   : > { %v1307_v2 = vpop.f32.mrb[35].mxu0 }
 0x170   : > { %v673_v3 = vadd.f32 %v1305_v0, %v1890_v53  ;;  %v1308_v4 = vadd.f32 %v1307_v2, %v1306_v1  ;;  %1392 = vmatmul.mubr.msk.bf16.gmra.mrb[28].mxu1 %vm822_vm0, %v774_v63 }
 0x172   : > { %v676_v5 = vadd.f32 %v1308_v4, %v1890_v53  ;;  %v751_v6 = vmax.f32 %v673_v3, 0.0 }
 0x174   : > { %v752_v7 = vmax.f32 %v676_v5, 0.0  ;;  %v1309_v8 = vpop.f32.mrb[36].mxu0 }
 0x175   : > { %v1310_v9 = vpop.f32.mrb[37].mxu0 }
 0x176   : > { %v775_v10 = vpack.c.bf16 %v752_v7, %v751_v6  ;;  %v1311_v11 = vadd.f32 %v1310_v9, %v1309_v8  ;;  %v1312_v12 = vpop.f32.mrb[38].mxu0 }
 0x177   : > { %v1313_v13 = vpop.f32.mrb[39].mxu0 }
 0x178   : > { %v681_v14 = vadd.f32 %v1311_v11, %v1890_v53  ;;  %v1314_v15 = vadd.f32 %v1313_v13, %v1312_v12  ;;  %1395 = vmatprep.mubr.msk.bf16.mxu1 %vm822_vm0, %v775_v10 }
 0x17a   : > { %v684_v16 = vadd.f32 %v1314_v15, %v1890_v53  ;;  %v753_v18 = vmax.f32 %v681_v14, 0.0 }
 0x17c   : > { %v754_v20 = vmax.f32 %v684_v16, 0.0  ;;  %v1315_v21 = vpop.f32.mrb[40].mxu0 }
 0x17d   : > { %v1316_v22 = vpop.f32.mrb[41].mxu0 }
 0x17e   : > { %v776_v23 = vpack.c.bf16 %v754_v20, %v753_v18  ;;  %v1317_v24 = vadd.f32 %v1316_v22, %v1315_v21  ;;  %v1318_v25 = vpop.f32.mrb[42].mxu0 }
 0x17f   : > { %v1319_v26 = vpop.f32.mrb[43].mxu0 }
 0x180   : > { %v689_v27 = vadd.f32 %v1317_v24, %v1890_v53  ;;  %v1320_v28 = vadd.f32 %v1319_v26, %v1318_v25  ;;  %1396 = vmatmul.mubr.msk.bf16.gmra.mrb[32].mxu1 %vm822_vm0, %v776_v23 }
 0x182   : > { %v692_v29 = vadd.f32 %v1320_v28, %v1890_v53  ;;  %v755_v30 = vmax.f32 %v689_v27, 0.0 }
 0x184   : > { %v756_v31 = vmax.f32 %v692_v29, 0.0  ;;  %v1321_v32 = vpop.f32.mrb[44].mxu0 }
 0x185   : > { %v1322_v33 = vpop.f32.mrb[45].mxu0 }
 0x186   : > { %v777_v34 = vpack.c.bf16 %v756_v31, %v755_v30  ;;  %v1323_v35 = vadd.f32 %v1322_v33, %v1321_v32  ;;  %v1324_v36 = vpop.f32.mrb[46].mxu0 }
 0x187   : > { %v1325_v37 = vpop.f32.mrb[47].mxu0 }
 0x188   : > { %v697_v38 = vadd.f32 %v1323_v35, %v1890_v53  ;;  %v1326_v40 = vadd.f32 %v1325_v37, %v1324_v36  ;;  %1399 = vmatprep.mubr.msk.bf16.mxu1 %vm822_vm0, %v777_v34 }
 0x18a   : > { %v700_v41 = vadd.f32 %v1326_v40, %v1890_v53  ;;  %v757_v42 = vmax.f32 %v697_v38, 0.0  ;;  %v1955_v53 = vld [vmem:[%s2080_s4] ss:$0 sm:$0xff] }
 0x18c   : > { %v758_v43 = vmax.f32 %v700_v41, 0.0 }
 0x18e   : > { %v778_v44 = vpack.c.bf16 %v758_v43, %v757_v42 }
 0x190   : > { %1400 = vmatmul.mubr.msk.bf16.gmra.mrb[36].mxu1 %vm822_vm0, %v778_v44 }
 0x191   : > { %1403 = vmatprep.mubr.msk.bf16.mxu1 %vm822_vm0, %v1896_v17 }
 0x198   : > { %1404 = vmatmul.mubr.msk.bf16.gmra.mrb[40].mxu1 %vm822_vm0, %v1903_v39 }
 0x199   : > { %1407 = vmatprep.mubr.msk.bf16.mxu1 %vm822_vm0, %v1910_v62 }
 0x1a0   : > { %1408 = vmatmul.mubr.msk.bf16.gmra.mrb[44].mxu1 %vm822_vm0, %v1917_v19 }
 0x213   : > { %v1381_v45 = vpop.f32.mrb[16].mxu1 }
 0x214   : > { %v914_v46 = vadd.f32 %v1381_v45, %v1955_v53  ;;  %v905_v47 = vpop.f32.mrb[17].mxu1 }
 0x215   : > { %v906_v17 = vadd.f32 %v1955_v53, %v905_v47  ;;  %v1382_v48 = vpop.f32.mrb[18].mxu1 }
 0x216   : > { %1034 = vst [vmem:[%s1961_s8 + $0x10] sm:$0xff] %v914_v46  ;;  %v917_v39 = vadd.f32 %v1382_v48, %v1955_v53  ;;  %v908_v62 = vpop.f32.mrb[19].mxu1 }
 0x217   : > { %1032 = vst [vmem:[%s1961_s8] sm:$0xff] %v906_v17  ;;  %v909_v19 = vadd.f32 %v1955_v53, %v908_v62 }
 0x218   : > { %1035 = vst [vmem:[%s1961_s8 + $0x18] sm:$0xff] %v917_v39 }
 0x219   : > { %1033 = vst [vmem:[%s1961_s8 + $0x8] sm:$0xff] %v909_v19 }
 0x223   : > { %v1385_v49 = vpop.f32.mrb[20].mxu1 }
 0x224   : > { %v930_v50 = vadd.f32 %v1385_v49, %v1955_v53  ;;  %v921_v51 = vpop.f32.mrb[21].mxu1 }
 0x225   : > { %v922_v52 = vadd.f32 %v1955_v53, %v921_v51  ;;  %v1386_v54 = vpop.f32.mrb[22].mxu1 }
 0x226   : > { %1038 = vst [vmem:[%s1961_s8 + $0x30] sm:$0xff] %v930_v50  ;;  %v933_v55 = vadd.f32 %v1386_v54, %v1955_v53  ;;  %v924_v56 = vpop.f32.mrb[23].mxu1 }
 0x227   : > { %1036 = vst [vmem:[%s1961_s8 + $0x20] sm:$0xff] %v922_v52  ;;  %v925_v57 = vadd.f32 %v1955_v53, %v924_v56 }
 0x228   : > { %1039 = vst [vmem:[%s1961_s8 + $0x38] sm:$0xff] %v933_v55 }
 0x229   : > { %1037 = vst [vmem:[%s1961_s8 + $0x28] sm:$0xff] %v925_v57 }
 0x233   : > { %v1389_v58 = vpop.f32.mrb[24].mxu1 }
 0x234   : > { %v946_v59 = vadd.f32 %v1389_v58, %v1955_v53  ;;  %v937_v60 = vpop.f32.mrb[25].mxu1 }
 0x235   : > { %v938_v61 = vadd.f32 %v1955_v53, %v937_v60  ;;  %v1390_v63 = vpop.f32.mrb[26].mxu1 }
 0x236   : > { %1042 = vst [vmem:[%s1961_s8 + $0x50] sm:$0xff] %v946_v59  ;;  %v949_v0 = vadd.f32 %v1390_v63, %v1955_v53  ;;  %v940_v1 = vpop.f32.mrb[27].mxu1 }
 0x237   : > { %1040 = vst [vmem:[%s1961_s8 + $0x40] sm:$0xff] %v938_v61  ;;  %v941_v2 = vadd.f32 %v1955_v53, %v940_v1 }
 0x238   : > { %1043 = vst [vmem:[%s1961_s8 + $0x58] sm:$0xff] %v949_v0 }
 0x239   : > { %1041 = vst [vmem:[%s1961_s8 + $0x48] sm:$0xff] %v941_v2 }
 0x243   : > { %v1393_v3 = vpop.f32.mrb[28].mxu1 }
 0x244   : > { %v962_v4 = vadd.f32 %v1393_v3, %v1955_v53  ;;  %v953_v5 = vpop.f32.mrb[29].mxu1 }
 0x245   : > { %v954_v6 = vadd.f32 %v1955_v53, %v953_v5  ;;  %v1394_v7 = vpop.f32.mrb[30].mxu1 }
 0x246   : > { %1046 = vst [vmem:[%s1961_s8 + $0x70] sm:$0xff] %v962_v4  ;;  %v965_v8 = vadd.f32 %v1394_v7, %v1955_v53  ;;  %v956_v9 = vpop.f32.mrb[31].mxu1 }
 0x247   : > { %1044 = vst [vmem:[%s1961_s8 + $0x60] sm:$0xff] %v954_v6  ;;  %v957_v10 = vadd.f32 %v1955_v53, %v956_v9 }
 0x248   : > { %1047 = vst [vmem:[%s1961_s8 + $0x78] sm:$0xff] %v965_v8 }
 0x249   : > { %1045 = vst [vmem:[%s1961_s8 + $0x68] sm:$0xff] %v957_v10 }
 0x253   : > { %v1397_v11 = vpop.f32.mrb[32].mxu1 }
 0x254   : > { %v978_v12 = vadd.f32 %v1397_v11, %v1955_v53  ;;  %v969_v13 = vpop.f32.mrb[33].mxu1 }
 0x255   : > { %v970_v14 = vadd.f32 %v1955_v53, %v969_v13  ;;  %v1398_v15 = vpop.f32.mrb[34].mxu1 }
 0x256   : > { %1050 = vst [vmem:[%s1961_s8 + $0x90] sm:$0xff] %v978_v12  ;;  %v981_v16 = vadd.f32 %v1398_v15, %v1955_v53  ;;  %v972_v18 = vpop.f32.mrb[35].mxu1 }
 0x257   : > { %1048 = vst [vmem:[%s1961_s8 + $0x80] sm:$0xff] %v970_v14  ;;  %v973_v20 = vadd.f32 %v1955_v53, %v972_v18 }
 0x258   : > { %1051 = vst [vmem:[%s1961_s8 + $0x98] sm:$0xff] %v981_v16 }
 0x259   : > { %1049 = vst [vmem:[%s1961_s8 + $0x88] sm:$0xff] %v973_v20 }
 0x263   : > { %v1401_v21 = vpop.f32.mrb[36].mxu1 }
 0x264   : > { %v994_v22 = vadd.f32 %v1401_v21, %v1955_v53  ;;  %v985_v23 = vpop.f32.mrb[37].mxu1 }
 0x265   : > { %v986_v24 = vadd.f32 %v1955_v53, %v985_v23  ;;  %v1402_v25 = vpop.f32.mrb[38].mxu1 }
 0x266   : > { %1054 = vst [vmem:[%s1961_s8 + $0xb0] sm:$0xff] %v994_v22  ;;  %v997_v26 = vadd.f32 %v1402_v25, %v1955_v53  ;;  %v988_v27 = vpop.f32.mrb[39].mxu1 }
 0x267   : > { %1052 = vst [vmem:[%s1961_s8 + $0xa0] sm:$0xff] %v986_v24  ;;  %v989_v28 = vadd.f32 %v1955_v53, %v988_v27 }
 0x268   : > { %1055 = vst [vmem:[%s1961_s8 + $0xb8] sm:$0xff] %v997_v26 }
 0x269   : > { %1053 = vst [vmem:[%s1961_s8 + $0xa8] sm:$0xff] %v989_v28 }
 0x26b   : > { %v1405_v29 = vpop.f32.mrb[40].mxu1 }
 0x26c   : > { %v1010_v30 = vadd.f32 %v1405_v29, %v1955_v53  ;;  %v1001_v31 = vpop.f32.mrb[41].mxu1 }
 0x26d   : > { %v1002_v32 = vadd.f32 %v1955_v53, %v1001_v31  ;;  %v1406_v33 = vpop.f32.mrb[42].mxu1 }
 0x26e   : > { %1058 = vst [vmem:[%s1961_s8 + $0xd0] sm:$0xff] %v1010_v30  ;;  %v1013_v34 = vadd.f32 %v1406_v33, %v1955_v53  ;;  %v1004_v35 = vpop.f32.mrb[43].mxu1 }
 0x26f   : > { %1056 = vst [vmem:[%s1961_s8 + $0xc0] sm:$0xff] %v1002_v32  ;;  %v1005_v36 = vadd.f32 %v1955_v53, %v1004_v35 }
 0x270   : > { %1059 = vst [vmem:[%s1961_s8 + $0xd8] sm:$0xff] %v1013_v34 }
 0x271   : > { %1057 = vst [vmem:[%s1961_s8 + $0xc8] sm:$0xff] %v1005_v36 }
 0x273   : > { %v1409_v37 = vpop.f32.mrb[44].mxu1 }
 0x274   : > { %v1026_v38 = vadd.f32 %v1409_v37, %v1955_v53  ;;  %v1017_v40 = vpop.f32.mrb[45].mxu1 }
 0x275   : > { %v1018_v41 = vadd.f32 %v1955_v53, %v1017_v40  ;;  %v1410_v42 = vpop.f32.mrb[46].mxu1 }
 0x276   : > { %1062 = vst [vmem:[%s1961_s8 + $0xf0] sm:$0xff] %v1026_v38  ;;  %v1029_v43 = vadd.f32 %v1410_v42, %v1955_v53  ;;  %v1020_v44 = vpop.f32.mrb[47].mxu1 }
 0x277   : > { %1060 = vst [vmem:[%s1961_s8 + $0xe0] sm:$0xff] %v1018_v41  ;;  %v1021_v45 = vadd.f32 %v1955_v53, %v1020_v44 }
 0x278   : > { %1063 = vst [vmem:[%s1961_s8 + $0xf8] sm:$0xff] %v1029_v43 }
 0x279   : > { %1061 = vst [vmem:[%s1961_s8 + $0xe8] sm:$0xff] %v1021_v45 }
 0x27a   : > { %1588 = shalt.err (!%p1585_p2)
}
 0x27b   : > { %s1589_s26 = scalar_lea.hbm %s2026_s29, 4096  ;;  %s1593_s15 = scalar_lea.hbm %s2081_s5, 8192 }
 0x27c   : > { %p1590_p4 = scmp.ne.s32.totalorder %s2026_s29, %s1589_s26  ;;  %p1594_p9 = scmp.lt.u32.totalorder %s2026_s29, %s2081_s5 }
 0x27d   : > { %p1595_p1 = scmp.lt.u32.totalorder %s1593_s15, %s1589_s26  ;;  %p1597_p6 = scmp.lt.u32.totalorder %s1589_s26, %s2026_s29 }
 0x27e   : > { %p1591_p5 = pnand %p1590_p4, %p2088_p11 }
 0x27f   : > { %p1596_p3 = por %p1595_p1, %p1594_p9 }
 0x280   : > { %p1592_p7 = pneg %p1591_p5 }
 0x281   : > { %p1598_p12 = por %p1597_p6, %p1596_p3 }
 0x283   : > { %p1599_p13 = pnand %p1598_p12, %p1592_p7 }
 0x285   : > { %1602 = shalt.err (!%p1599_p13)
}
 0x286   : > { %s1647_s25 = smov 128   ;;  %s1648_s9 = smov 8  }
 0x287   : > { %1429 = dma.vmem_to_hbm [thread:$0]  (%p2088_p11), %s2028_s7, 4096, %s2026_s29, %s1065_s22, %s1647_s25, %s1647_s25, %s1648_s9  }
 0x288 PF: > { %s1093_s10 = sand.u32 1, %s1629_s18   ;;  %p2089_p8 = scmp.ne.s32.totalorder %s2086_s6, 0 }
 0x289   : > { %p2090_p10 = scmp.ge.s32.totalorder %s1641_s21, 2  ;;  %s1094_s11 = scalar_lea.sflag [#allocation4], %s1093_s10 }
 0x28b   : > { %p1436_p0 = pnand %p2090_p10, %p2089_p8 }
 0x28d   : > { %1624 = dma.done.wait (!%p1436_p0), %s1094_s11, 4096  }
 0x28e   : > { %1626 = vsyncadd (!%p1436_p0), %s1094_s11, 4294963200  ;;  %p18_p2 = scmp.ge.s32.totalorder %s1704_s24, 4   ;;  %s2091_s18 = smov %s1633_s19 }
 0x28f   : > { %s2092_s19 = smov %s1637_s20  ;;  %s2093_s20 = smov %s1716_s27 }
 0x290   : > { %s2094_s21 = smov %s1704_s24  ;;  %20 = sbr.rel (!%p18_p2) target bundleno = 5 (0x5), region = 85 }
 0x297   :  { %1099 = vsyncpa [#allocation3], 1 }
 0x298   :  { %1101 = vsyncpa [#allocation3 + $0x1], 1 }
 0x299   :  { %1102 = vsyncpa [#allocation4], 1 }
 0x29a   :  { %1104 = vsyncpa [#allocation4 + $0x1], 1 }

// kernel: _pallas_encoder.1
= control target key start
LH: loop header
LB: loop body
LE: loop exit
PB: predicated region body
PF: predicated region fallthrough
CT: control target
= control target key end

     0   :  { %10 = vsyncpa [#allocation3], 0  ;;  %s2076_s0 = inlined_call_operand.hbm [shape: bf16[512,256], index: 0, kind: input, shape index: {}]   ;;  %s2077_s1 = inlined_call_operand.vmem [shape: bf16[256,64], index: 1, kind: input, shape index: {}]   ;;  %s2078_s2 = inlined_call_operand.vmem [shape: f32[1,64], index: 2, kind: input, shape index: {}]   ;;  %s2079_s3 = inlined_call_operand.vmem [shape: bf16[64,128], index: 3, kind: input, shape index: {}]   ;;  %s2080_s4 = inlined_call_operand.vmem [shape: f32[1,128], index: 4, kind: input, shape index: {}]   ;;  %s2081_s5 = inlined_call_operand.hbm [shape: f32[512,128], index: 5, kind: output, shape index: {}]  }
   0x1   :  { %12 = vsyncpa [#allocation3 + $0x1], 0 }
   0x2   :  { %13 = vsyncpa [#allocation4], 0 }
   0x3   :  { %15 = vsyncpa [#allocation4 + $0x1], 0  ;;  %s1679_s18 = smov 0   ;;  %s1681_s19 = smov 0  }
   0x4   :  { %s1683_s20 = smov 0   ;;  %s1685_s21 = smov 0  }
   0x5 LB: > { %s1700_s22 = sadd.s32 4294967295, %s1641_s21   ;;  %s1151_s23 = sadd.s32 4294967294, %s1641_s21   ;;  %s1641_s21 = sphi %s1685_s21, %s2094_s21   ;;  %s1637_s20 = sphi %s1683_s20, %s2093_s20   ;;  %s1633_s19 = sphi %s1681_s19, %s2092_s19   ;;  %s1629_s18 = sphi %s1679_s18, %s2091_s18  }
   0x6   : > { %s1704_s24 = sadd.s32 1, %s1641_s21   ;;  %s28_s25 = sadd.s32 1, %s1637_s20 }
   0x7   : > { %s25_s26 = ssub.s32 %s1641_s21, %s1704_s24  ;;  %p35_p0 = scmp.ne.s32.totalorder %s1637_s20, %s1633_s19 }
   0x8   : > { %p26_p1 = scmp.eq.s32.totalorder %s25_s26, 0  ;;  %p36_p2 = scmp.eq.s32.totalorder %s1641_s21, 0 }
   0x9   : > { %p41_p3 = scmp.ne.s32.totalorder %s1633_s19, %s1629_s18  ;;  %p42_p4 = scmp.eq.s32.totalorder %s1700_s22, 0 }
   0xa   : > { %s1716_s27 = scalar_select %p26_p1, %s1637_s20, %s28_s25  }
   0xb   : > { %p1718_p5 = por %p36_p2, %p35_p0  ;;  %p1722_p6 = por %p42_p4, %p41_p3 }
   0xc   : > { %p149_p7 = scmp.eq.s32.totalorder %s1700_s22, 1  ;;  %p155_p8 = scmp.eq.s32.totalorder %s1151_s23, 1 }
   0xd   : > { %p1439_p10 = scmp.lt.s32.totalorder %s1641_s21, 2  ;;  %s187_s7 = sand.u32 1, %s1637_s20  }
   0xe   : > { %p1729_p11 = por %p149_p7, %p35_p0  ;;  %p1733_p12 = por %p155_p8, %p41_p3 }
   0xf   : > { %s1237_s8 = sshll.u32 %s1641_s21, 12  ;;  %s1154_s9 = sshll.u32 %s187_s7, 8 }
  0x10   : > { %s2085_s30 = scalar_select %p1729_p11, 1, 0 }
  0x11   : > { %s2086_s6 = scalar_select %p1733_p12, 1, 0 }
  0x12   : > { %s1742_s12 = scalar_lea.hbm %s2076_s0, %s1237_s8  ;;  %s191_s13 = scalar_lea.vmem [#allocation2], %s1154_s9 }
  0x13   : > { %s199_s14 = sshll.u32 %s191_s13, 4  ;;  %p1746_p13 = pnand %p1439_p10, %p1718_p5  ;;  %s1750_s14 = int_to_ptr.vmem [resolvable:$true] %s199_s14 }
  0x14   : > { %s1752_s16 = scalar_lea.sflag [#allocation3], %s187_s7  ;;  %s1545_s17 = scalar_lea.hbm %s1742_s12, 4096 }
  0x15   : > { %p1546_p0 = scmp.ne.s32.totalorder %s1742_s12, %s1545_s17  ;;  %p1547_p1 = pneg %p1746_p13 }
  0x16   : > { %s1550_s26 = scalar_lea.hbm %s2076_s0, 8192  ;;  %p1551_p4 = scmp.lt.u32.totalorder %s1742_s12, %s2076_s0 }
  0x17   : > { %p1548_p2 = pnand %p1547_p1, %p1546_p0  ;;  %p1552_p5 = scmp.lt.u32.totalorder %s1550_s26, %s1545_s17 }
  0x18   : > { %p1554_p8 = scmp.lt.u32.totalorder %s1545_s17, %s1742_s12 }
  0x19   : > { %p1549_p3 = pneg %p1548_p2  ;;  %p1553_p7 = por %p1552_p5, %p1551_p4 }
  0x1b   : > { %p1555_p10 = por %p1554_p8, %p1553_p7 }
  0x1d   : > { %p1556_p9 = pnand %p1555_p10, %p1549_p3 }
  0x1f   : > { %1559 = shalt.err (!%p1556_p9)
}
  0x20   : > { %s1560_s7 = scalar_lea.vmem %s1750_s14, 4096  ;;  %s1643_s9 = smov [#allocation2]  }
  0x21   : > { %p1561_p0 = scmp.ne.s32.totalorder %s1750_s14, %s1560_s7  ;;  %s1565_s10 = sshll.u32 %s1643_s9, 4  ;;  %s1566_s10 = int_to_ptr.vmem [resolvable:$false] %s1565_s10 }
  0x22   : > { %s1567_s11 = scalar_lea.vmem %s1566_s10, 8192  ;;  %p1568_p11 = scmp.lt.s32.totalorder %s1750_s14, %s1566_s10 }
  0x23   : > { %p1563_p2 = pnand %p1561_p0, %p1547_p1  ;;  %p1569_p4 = scmp.lt.s32.totalorder %s1567_s11, %s1560_s7 }
  0x25   : > { %p1564_p12 = pneg %p1563_p2  ;;  %p1570_p5 = por %p1569_p4, %p1568_p11 }
  0x27   : > { %p1571_p7 = pnand %p1570_p5, %p1564_p12 }
  0x29   : > { %1574 = shalt.err (!%p1571_p7)
}
  0x2a   : > { %s1644_s13 = smov 128   ;;  %s1645_s17 = smov 8  }
  0x2b   : > { %1434 = dma.hbm_to_vmem [thread:$0]  (!%p1746_p13), %s1742_s12, 4096, %s1750_s14, %s1752_s16, %s1644_s13, %s1644_s13, %s1645_s17  }
  0x2c   : > { %p1158_p9 = scmp.ge.s32.totalorder %s1641_s21, 1  ;;  %p207_p1 = scmp.lt.s32.totalorder %s1641_s21, 3 }
  0x2e   : > { %p208_p3 = pnand %p1158_p9, %p207_p1 }
  0x2f   : > { %s1783_s23 = sand.u32 (!%p208_p3), 1, %s1633_s19  }
  0x30   : > { %211 = sbr.rel (%p208_p3) target bundleno = 648 (0x288), region = 40  ;;  %s1159_s25 = sshll.u32 (!%p208_p3), %s1783_s23, 8 }
  0x31   : > { %s214_s26 = scalar_lea.sflag (!%p208_p3), [#allocation3], %s1783_s23  ;;  %s1789_s28 = scalar_lea.vmem (!%p208_p3), [#allocation2], %s1159_s25 }
  0x37   : > { %1620 = dma.done.wait (%p1722_p6), %s214_s26, 4096  }
  0x38   : > { %1622 = vsyncadd (%p1722_p6), %s214_s26, 4294963200  ;;  %v1477_v0 = vld [vmem:[%s2077_s1 + $0x40] sm:$0xff]   ;;  %v1479_v2 = vld [vmem:[%s2077_s1 + $0x48] sm:$0xff]   ;;  %vm822_vm0 = vcmask 523264   ;;  %s1961_s8 = scalar_lea.vmem [#allocation5], %s1159_s25  ;;  %s1238_s25 = sshll.u32 %s1700_s22, 12 }
  0x39   : > { %v1478_v1 = vld [vmem:[%s2077_s1] sm:$0xff]   ;;  %1239 = vmatprep.subr.bf16.mxu0 %v1477_v0  ;;  %1411 = vmatprep.subr.bf16.mxu1 %v1477_v0  ;;  %v1480_v3 = vld [vmem:[%s2077_s1 + $0x8] sm:$0xff]   ;;  %v1481_v4 = vld [vmem:[%s2077_s1 + $0x50] sm:$0xff]   ;;  %s1078_s7 = sshll.u32 %s1961_s8, 4  ;;  %s2026_s29 = scalar_lea.hbm %s2081_s5, %s1238_s25  ;;  %s2028_s7 = int_to_ptr.vmem [resolvable:$true] %s1078_s7 }
  0x3a   : > { %1240 = vmatpush3.bf16.msra.mxu0 %v1478_v1  ;;  %1419 = vmatpush3.bf16.msra.mxu1 %v1478_v1  ;;  %v1482_v5 = vld [vmem:[%s2077_s1 + $0x10] sm:$0xff]   ;;  %v1483_v6 = vld [vmem:[%s2077_s1 + $0x58] sm:$0xff]   ;;  %v1485_v8 = vld [vmem:[%s2077_s1 + $0x60] sm:$0xff]   ;;  %s1065_s22 = scalar_lea.sflag [#allocation4], %s1783_s23  ;;  %s1575_s11 = scalar_lea.vmem %s2028_s7, 4096 }
  0x3b   : > { %1241 = vmatprep.subr.bf16.mxu0 %v1479_v2  ;;  %1412 = vmatprep.subr.bf16.mxu1 %v1479_v2  ;;  %v1484_v7 = vld [vmem:[%s2077_s1 + $0x18] sm:$0xff]   ;;  %v1486_v9 = vld [vmem:[%s2077_s1 + $0x20] sm:$0xff]   ;;  %v1487_v10 = vld [vmem:[%s2077_s1 + $0x68] sm:$0xff]   ;;  %p1576_p6 = scmp.ne.s32.totalorder %s2028_s7, %s1575_s11  ;;  %p2088_p11 = scmp.ne.s32.totalorder %s2085_s30, 0 }
  0x3c   : > { %v1495_v11 = vld [vmem:[%s1789_s28 + $0x4] ss:$8 sps:$4 sm:$0xff]   ;;  %v1489_v13 = vld [vmem:[%s2077_s1 + $0x70] sm:$0xff]   ;;  %v1491_v15 = vld [vmem:[%s2077_s1 + $0x78] sm:$0xff]   ;;  %s1646_s13 = smov [#allocation5]  }
  0x3d   : > { %v1488_v12 = vld [vmem:[%s2077_s1 + $0x28] sm:$0xff]   ;;  %606 = vmatprep.mubr.bf16.mxu0 %v1495_v11  ;;  %v1490_v14 = vld [vmem:[%s2077_s1 + $0x30] sm:$0xff]   ;;  %v1492_v16 = vld [vmem:[%s2077_s1 + $0x38] sm:$0xff]   ;;  %p1577_p12 = pnand %p1576_p6, %p2088_p11  ;;  %s1579_s17 = sshll.u32 %s1646_s13, 4  ;;  %s1580_s17 = int_to_ptr.vmem [resolvable:$false] %s1579_s17 }
  0x3e   : > { %1242 = vmatpush3.bf16.msra.mxu0 %v1480_v3  ;;  %1420 = vmatpush3.bf16.msra.mxu1 %v1480_v3  ;;  %v1493_v17 = vld [vmem:[%s1789_s28] ss:$8 sps:$4 sm:$0xff]   ;;  %v1525_v18 = vld [vmem:[%s1789_s28 + $0xc4] ss:$8 sps:$4 sm:$0xff]   ;;  %v1496_v19 = vld [vmem:[%s1789_s28 + $0x14] ss:$8 sps:$4 sm:$0xff]   ;;  %p1582_p8 = scmp.lt.s32.totalorder %s2028_s7, %s1580_s17 }
  0x3f   : > { %1243 = vmatprep.subr.bf16.mxu0 %v1481_v4  ;;  %1413 = vmatprep.subr.bf16.mxu1 %v1481_v4  ;;  %v1523_v20 = vld [vmem:[%s1789_s28 + $0xc0] ss:$8 sps:$4 sm:$0xff]   ;;  %v1529_v21 = vld [vmem:[%s1789_s28 + $0xd4] ss:$8 sps:$4 sm:$0xff]   ;;  %v1498_v22 = vld [vmem:[%s1789_s28 + $0x10] ss:$8 sps:$4 sm:$0xff]   ;;  %p1578_p13 = pneg %p1577_p12 }
  0x40   : > { %702 = vmatprep.mubr.bf16.mxu1 %v1525_v18  ;;  %v1499_v23 = vld [vmem:[%s1789_s28 + $0x24] ss:$8 sps:$4 sm:$0xff]   ;;  %v1531_v24 = vld [vmem:[%s1789_s28 + $0xd0] ss:$8 sps:$4 sm:$0xff]   ;;  %v1501_v26 = vld [vmem:[%s1789_s28 + $0x20] ss:$8 sps:$4 sm:$0xff]  }
  0x41   : > { %v1535_v25 = vld [vmem:[%s1789_s28 + $0xe4] ss:$8 sps:$4 sm:$0xff]   ;;  %v1502_v27 = vld [vmem:[%s1789_s28 + $0x34] ss:$8 sps:$4 sm:$0xff]   ;;  %v1537_v28 = vld [vmem:[%s1789_s28 + $0xe0] ss:$8 sps:$4 sm:$0xff]  }
  0x42   : > { %1244 = vmatpush3.bf16.msra.mxu0 %v1482_v5  ;;  %1421 = vmatpush3.bf16.msra.mxu1 %v1482_v5  ;;  %v1538_v29 = vld [vmem:[%s1789_s28 + $0xf4] ss:$8 sps:$4 sm:$0xff]   ;;  %v1504_v30 = vld [vmem:[%s1789_s28 + $0x30] ss:$8 sps:$4 sm:$0xff]   ;;  %v1505_v31 = vld [vmem:[%s1789_s28 + $0x44] ss:$8 sps:$4 sm:$0xff]  }
  0x43   : > { %1245 = vmatprep.subr.bf16.mxu0 %v1483_v6  ;;  %1414 = vmatprep.subr.bf16.mxu1 %v1483_v6  ;;  %v1540_v32 = vld [vmem:[%s1789_s28 + $0xf0] ss:$8 sps:$4 sm:$0xff]   ;;  %v1507_v33 = vld [vmem:[%s1789_s28 + $0x40] ss:$8 sps:$4 sm:$0xff]   ;;  %v1508_v34 = vld [vmem:[%s1789_s28 + $0x54] ss:$8 sps:$4 sm:$0xff]  }
  0x44   : > { %v1510_v35 = vld [vmem:[%s1789_s28 + $0x50] ss:$8 sps:$4 sm:$0xff]   ;;  %v1511_v36 = vld [vmem:[%s1789_s28 + $0x64] ss:$8 sps:$4 sm:$0xff]   ;;  %v1513_v37 = vld [vmem:[%s1789_s28 + $0x60] ss:$8 sps:$4 sm:$0xff]  }
  0x45   : > { %v1514_v38 = vld [vmem:[%s1789_s28 + $0x74] ss:$8 sps:$4 sm:$0xff]   ;;  %v1516_v39 = vld [vmem:[%s1789_s28 + $0x70] ss:$8 sps:$4 sm:$0xff]   ;;  %v1517_v40 = vld [vmem:[%s1789_s28 + $0x84] ss:$8 sps:$4 sm:$0xff]  }
  0x46   : > { %1246 = vmatpush3.bf16.msra.mxu0 %v1484_v7  ;;  %1422 = vmatpush3.bf16.msra.mxu1 %v1484_v7  ;;  %v1519_v41 = vld [vmem:[%s1789_s28 + $0x80] ss:$8 sps:$4 sm:$0xff]   ;;  %v1520_v42 = vld [vmem:[%s1789_s28 + $0x94] ss:$8 sps:$4 sm:$0xff]   ;;  %v1522_v43 = vld [vmem:[%s1789_s28 + $0x90] ss:$8 sps:$4 sm:$0xff]  }
  0x47   : > { %1247 = vmatprep.subr.bf16.mxu0 %v1485_v8  ;;  %1415 = vmatprep.subr.bf16.mxu1 %v1485_v8  ;;  %v1526_v44 = vld [vmem:[%s1789_s28 + $0xa4] ss:$8 sps:$4 sm:$0xff]   ;;  %v1528_v45 = vld [vmem:[%s1789_s28 + $0xa0] ss:$8 sps:$4 sm:$0xff]   ;;  %v1532_v46 = vld [vmem:[%s1789_s28 + $0xb4] ss:$8 sps:$4 sm:$0xff]  }
  0x48   : > { %v1534_v47 = vld [vmem:[%s1789_s28 + $0xb0] ss:$8 sps:$4 sm:$0xff]   ;;  %v1541_v48 = vld [vmem:[%s2079_s3] sm:$0xff]   ;;  %v1542_v49 = vld [vmem:[%s2079_s3 + $0x8] sm:$0xff]   ;;  %s1581_s28 = scalar_lea.vmem %s1580_s17, 8192 }
  0x49   : > { %v1543_v50 = vld [vmem:[%s2079_s3 + $0x10] sm:$0xff]   ;;  %v1544_v51 = vld [vmem:[%s2079_s3 + $0x18] sm:$0xff]   ;;  %v1890_v53 = vld [vmem:[%s2078_s2] ss:$0 sm:$0xff]  ;;  %p1583_p10 = scmp.lt.s32.totalorder %s1581_s28, %s1575_s11 }
  0x4a   : > { %1248 = vmatpush3.bf16.msra.mxu0 %v1486_v9  ;;  %1423 = vmatpush3.bf16.msra.mxu1 %v1486_v9 }
  0x4b   : > { %1249 = vmatprep.subr.bf16.mxu0 %v1487_v10  ;;  %1416 = vmatprep.subr.bf16.mxu1 %v1487_v10  ;;  %p1584_p0 = por %p1583_p10, %p1582_p8 }
  0x4d   : > { %p1585_p2 = pnand %p1584_p0, %p1578_p13 }
  0x4e   : > { %1250 = vmatpush3.bf16.msra.mxu0 %v1488_v12  ;;  %1424 = vmatpush3.bf16.msra.mxu1 %v1488_v12 }
  0x4f   : > { %1251 = vmatprep.subr.bf16.mxu0 %v1489_v13  ;;  %1417 = vmatprep.subr.bf16.mxu1 %v1489_v13 }
  0x52   : > { %1252 = vmatpush3.bf16.msra.mxu0 %v1490_v14  ;;  %1425 = vmatpush3.bf16.msra.mxu1 %v1490_v14 }
  0x53   : > { %1253 = vmatprep.subr.bf16.mxu0 %v1491_v15  ;;  %1418 = vmatprep.subr.bf16.mxu1 %v1491_v15 }
  0x56   : > { %1254 = vmatpush3.bf16.msra.mxu0 %v1492_v16  ;;  %1426 = vmatpush3.bf16.msra.mxu1 %v1492_v16 }
  0x57   : > { %1371 = vmatprep.subr.bf16.mxu1 %v1541_v48 }
  0x59   : > { %607 = vmatmul.mubr.bf16.vlgmr.msra.gmra.mrb[0].mxu0 %v1493_v17  ;;  %703 = vmatmul.mubr.bf16.vlgmr.msra.gmra.mrb[0].mxu1 %v1523_v20 }
  0x5a   : > { %614 = vmatprep.mubr.bf16.mxu0 %v1496_v19  ;;  %710 = vmatprep.mubr.bf16.mxu1 %v1529_v21 }
  0x5b   : > { %1372 = vmatpush3.bf16.msra.mxu1 %v1541_v48 }
  0x5c   : > { %1373 = vmatprep.subr.bf16.mxu1 %v1542_v49 }
  0x5f   : > { %1374 = vmatpush3.bf16.msra.mxu1 %v1542_v49 }
  0x60   : > { %1375 = vmatprep.subr.bf16.mxu1 %v1543_v50 }
  0x61   : > { %615 = vmatmul.mubr.bf16.gmra.mrb[4].mxu0 %v1498_v22  ;;  %711 = vmatmul.mubr.bf16.gmra.mrb[4].mxu1 %v1531_v24 }
  0x62   : > { %622 = vmatprep.mubr.bf16.mxu0 %v1499_v23  ;;  %718 = vmatprep.mubr.bf16.mxu1 %v1535_v25 }
  0x63   : > { %1376 = vmatpush3.bf16.msra.mxu1 %v1543_v50 }
  0x64   : > { %1377 = vmatprep.subr.bf16.mxu1 %v1544_v51 }
  0x67   : > { %1378 = vmatpush3.bf16.msra.mxu1 %v1544_v51 }
  0x69   : > { %623 = vmatmul.mubr.bf16.gmra.mrb[8].mxu0 %v1501_v26  ;;  %719 = vmatmul.mubr.bf16.gmra.mrb[8].mxu1 %v1537_v28 }
  0x6a   : > { %630 = vmatprep.mubr.bf16.mxu0 %v1502_v27  ;;  %726 = vmatprep.mubr.bf16.mxu1 %v1538_v29 }
  0x71   : > { %631 = vmatmul.mubr.bf16.gmra.mrb[12].mxu0 %v1504_v30  ;;  %727 = vmatmul.mubr.bf16.gmra.mrb[12].mxu1 %v1540_v32 }
  0x72   : > { %638 = vmatprep.mubr.bf16.mxu0 %v1505_v31 }
  0x79   : > { %639 = vmatmul.mubr.bf16.gmra.mrb[16].mxu0 %v1507_v33 }
  0x7a   : > { %646 = vmatprep.mubr.bf16.mxu0 %v1508_v34 }
  0x81   : > { %647 = vmatmul.mubr.bf16.gmra.mrb[20].mxu0 %v1510_v35 }
  0x82   : > { %654 = vmatprep.mubr.bf16.mxu0 %v1511_v36 }
  0x89   : > { %655 = vmatmul.mubr.bf16.gmra.mrb[24].mxu0 %v1513_v37 }
  0x8a   : > { %662 = vmatprep.mubr.bf16.mxu0 %v1514_v38 }
  0x91   : > { %663 = vmatmul.mubr.bf16.gmra.mrb[28].mxu0 %v1516_v39 }
  0x92   : > { %670 = vmatprep.mubr.bf16.mxu0 %v1517_v40 }
  0x99   : > { %671 = vmatmul.mubr.bf16.gmra.mrb[32].mxu0 %v1519_v41 }
  0x9a   : > { %678 = vmatprep.mubr.bf16.mxu0 %v1520_v42 }
  0xa1   : > { %679 = vmatmul.mubr.bf16.gmra.mrb[36].mxu0 %v1522_v43 }
  0xa2   : > { %686 = vmatprep.mubr.bf16.mxu0 %v1526_v44 }
  0xa9   : > { %687 = vmatmul.mubr.bf16.gmra.mrb[40].mxu0 %v1528_v45 }
  0xaa   : > { %694 = vmatprep.mubr.bf16.mxu0 %v1532_v46 }
  0xb1   : > { %695 = vmatmul.mubr.bf16.gmra.mrb[44].mxu0 %v1534_v47 }
 0x12c   : > { %v1255_v52 = vpop.f32.mrb[0].mxu0  ;;  %v1327_v55 = vpop.f32.mrb[0].mxu1 }
 0x12d   : > { %v1256_v54 = vpop.f32.mrb[1].mxu0  ;;  %v1328_v58 = vpop.f32.mrb[1].mxu1 }
 0x12e   : > { %v1257_v56 = vadd.f32 %v1256_v54, %v1255_v52  ;;  %v1258_v57 = vpop.f32.mrb[2].mxu0  ;;  %v1329_v60 = vadd.f32 %v1328_v58, %v1327_v55  ;;  %v1330_v61 = vpop.f32.mrb[2].mxu1 }
 0x12f   : > { %v1259_v59 = vpop.f32.mrb[3].mxu0  ;;  %v1331_v0 = vpop.f32.mrb[3].mxu1 }
 0x130   : > { %v609_v62 = vadd.f32 %v1257_v56, %v1890_v53  ;;  %v1260_v63 = vadd.f32 %v1259_v59, %v1258_v57  ;;  %v705_v1 = vadd.f32 %v1329_v60, %v1890_v53  ;;  %v1332_v2 = vadd.f32 %v1331_v0, %v1330_v61 }
 0x132   : > { %v612_v3 = vadd.f32 %v1260_v63, %v1890_v53  ;;  %v759_v4 = vmax.f32 %v705_v1, 0.0  ;;  %v708_v5 = vadd.f32 %v1332_v2, %v1890_v53  ;;  %v735_v6 = vmax.f32 %v609_v62, 0.0 }
 0x134   : > { %v736_v7 = vmax.f32 %v612_v3, 0.0  ;;  %v1261_v8 = vpop.f32.mrb[4].mxu0  ;;  %v760_v10 = vmax.f32 %v708_v5, 0.0  ;;  %v1333_v11 = vpop.f32.mrb[4].mxu1 }
 0x135   : > { %v1262_v9 = vpop.f32.mrb[5].mxu0  ;;  %v1334_v15 = vpop.f32.mrb[5].mxu1 }
 0x136   : > { %v767_v12 = vpack.c.bf16 %v736_v7, %v735_v6  ;;  %v1263_v13 = vadd.f32 %v1262_v9, %v1261_v8  ;;  %v1264_v14 = vpop.f32.mrb[6].mxu0  ;;  %v1896_v17 = vpack.c.bf16 %v760_v10, %v759_v4  ;;  %v1335_v18 = vadd.f32 %v1334_v15, %v1333_v11  ;;  %v1336_v19 = vpop.f32.mrb[6].mxu1 }
 0x137   : > { %v1265_v16 = vpop.f32.mrb[7].mxu0  ;;  %v1337_v22 = vpop.f32.mrb[7].mxu1 }
 0x138   : > { %v617_v20 = vadd.f32 %v1263_v13, %v1890_v53  ;;  %v1266_v21 = vadd.f32 %v1265_v16, %v1264_v14  ;;  %1379 = vmatprep.mubr.msk.bf16.mxu1 %vm822_vm0, %v767_v12  ;;  %v713_v23 = vadd.f32 %v1335_v18, %v1890_v53  ;;  %v1338_v24 = vadd.f32 %v1337_v22, %v1336_v19 }
 0x13a   : > { %v620_v25 = vadd.f32 %v1266_v21, %v1890_v53  ;;  %v761_v26 = vmax.f32 %v713_v23, 0.0  ;;  %v716_v27 = vadd.f32 %v1338_v24, %v1890_v53  ;;  %v737_v28 = vmax.f32 %v617_v20, 0.0 }
 0x13c   : > { %v738_v29 = vmax.f32 %v620_v25, 0.0  ;;  %v1267_v30 = vpop.f32.mrb[8].mxu0  ;;  %v762_v32 = vmax.f32 %v716_v27, 0.0  ;;  %v1339_v33 = vpop.f32.mrb[8].mxu1 }
 0x13d   : > { %v1268_v31 = vpop.f32.mrb[9].mxu0  ;;  %v1340_v37 = vpop.f32.mrb[9].mxu1 }
 0x13e   : > { %v768_v34 = vpack.c.bf16 %v738_v29, %v737_v28  ;;  %v1269_v35 = vadd.f32 %v1268_v31, %v1267_v30  ;;  %v1270_v36 = vpop.f32.mrb[10].mxu0  ;;  %v1903_v39 = vpack.c.bf16 %v762_v32, %v761_v26  ;;  %v1341_v40 = vadd.f32 %v1340_v37, %v1339_v33  ;;  %v1342_v41 = vpop.f32.mrb[10].mxu1 }
 0x13f   : > { %v1271_v38 = vpop.f32.mrb[11].mxu0  ;;  %v1343_v44 = vpop.f32.mrb[11].mxu1 }
 0x140   : > { %v625_v42 = vadd.f32 %v1269_v35, %v1890_v53  ;;  %v1272_v43 = vadd.f32 %v1271_v38, %v1270_v36  ;;  %1380 = vmatmul.mubr.msk.bf16.vlgmr.msra.gmra.mrb[16].mxu1 %vm822_vm0, %v768_v34  ;;  %v721_v45 = vadd.f32 %v1341_v40, %v1890_v53  ;;  %v1344_v46 = vadd.f32 %v1343_v44, %v1342_v41 }
 0x142   : > { %v628_v47 = vadd.f32 %v1272_v43, %v1890_v53  ;;  %v763_v48 = vmax.f32 %v721_v45, 0.0  ;;  %v724_v49 = vadd.f32 %v1344_v46, %v1890_v53  ;;  %v739_v50 = vmax.f32 %v625_v42, 0.0 }
 0x144   : > { %v740_v51 = vmax.f32 %v628_v47, 0.0  ;;  %v1273_v52 = vpop.f32.mrb[12].mxu0  ;;  %v764_v55 = vmax.f32 %v724_v49, 0.0  ;;  %v1345_v56 = vpop.f32.mrb[12].mxu1 }
 0x145   : > { %v1274_v54 = vpop.f32.mrb[13].mxu0  ;;  %v1346_v60 = vpop.f32.mrb[13].mxu1 }
 0x146   : > { %v769_v57 = vpack.c.bf16 %v740_v51, %v739_v50  ;;  %v1275_v58 = vadd.f32 %v1274_v54, %v1273_v52  ;;  %v1276_v59 = vpop.f32.mrb[14].mxu0  ;;  %v1910_v62 = vpack.c.bf16 %v764_v55, %v763_v48  ;;  %v1347_v63 = vadd.f32 %v1346_v60, %v1345_v56  ;;  %v1348_v0 = vpop.f32.mrb[14].mxu1 }
 0x147   : > { %v1277_v61 = vpop.f32.mrb[15].mxu0  ;;  %v1349_v3 = vpop.f32.mrb[15].mxu1 }
 0x148   : > { %v633_v1 = vadd.f32 %v1275_v58, %v1890_v53  ;;  %v1278_v2 = vadd.f32 %v1277_v61, %v1276_v59  ;;  %1383 = vmatprep.mubr.msk.bf16.mxu1 %vm822_vm0, %v769_v57  ;;  %v729_v4 = vadd.f32 %v1347_v63, %v1890_v53  ;;  %v1350_v5 = vadd.f32 %v1349_v3, %v1348_v0 }
 0x14a   : > { %v636_v6 = vadd.f32 %v1278_v2, %v1890_v53  ;;  %v765_v7 = vmax.f32 %v729_v4, 0.0  ;;  %v732_v8 = vadd.f32 %v1350_v5, %v1890_v53  ;;  %v741_v9 = vmax.f32 %v633_v1, 0.0 }
 0x14c   : > { %v742_v10 = vmax.f32 %v636_v6, 0.0  ;;  %v1279_v11 = vpop.f32.mrb[16].mxu0  ;;  %v766_v13 = vmax.f32 %v732_v8, 0.0 }
 0x14d   : > { %v1280_v12 = vpop.f32.mrb[17].mxu0 }
 0x14e   : > { %v770_v14 = vpack.c.bf16 %v742_v10, %v741_v9  ;;  %v1281_v15 = vadd.f32 %v1280_v12, %v1279_v11  ;;  %v1282_v16 = vpop.f32.mrb[18].mxu0  ;;  %v1917_v19 = vpack.c.bf16 %v766_v13, %v765_v7 }
 0x14f   : > { %v1283_v18 = vpop.f32.mrb[19].mxu0 }
 0x150   : > { %v641_v20 = vadd.f32 %v1281_v15, %v1890_v53  ;;  %v1284_v21 = vadd.f32 %v1283_v18, %v1282_v16  ;;  %1384 = vmatmul.mubr.msk.bf16.gmra.mrb[20].mxu1 %vm822_vm0, %v770_v14 }
 0x152   : > { %v644_v22 = vadd.f32 %v1284_v21, %v1890_v53  ;;  %v743_v23 = vmax.f32 %v641_v20, 0.0 }
 0x154   : > { %v744_v24 = vmax.f32 %v644_v22, 0.0  ;;  %v1285_v25 = vpop.f32.mrb[20].mxu0 }
 0x155   : > { %v1286_v26 = vpop.f32.mrb[21].mxu0 }
 0x156   : > { %v771_v27 = vpack.c.bf16 %v744_v24, %v743_v23  ;;  %v1287_v28 = vadd.f32 %v1286_v26, %v1285_v25  ;;  %v1288_v29 = vpop.f32.mrb[22].mxu0 }
 0x157   : > { %v1289_v30 = vpop.f32.mrb[23].mxu0 }
 0x158   : > { %v649_v31 = vadd.f32 %v1287_v28, %v1890_v53  ;;  %v1290_v32 = vadd.f32 %v1289_v30, %v1288_v29  ;;  %1387 = vmatprep.mubr.msk.bf16.mxu1 %vm822_vm0, %v771_v27 }
 0x15a   : > { %v652_v33 = vadd.f32 %v1290_v32, %v1890_v53  ;;  %v745_v34 = vmax.f32 %v649_v31, 0.0 }
 0x15c   : > { %v746_v35 = vmax.f32 %v652_v33, 0.0  ;;  %v1291_v36 = vpop.f32.mrb[24].mxu0 }
 0x15d   : > { %v1292_v37 = vpop.f32.mrb[25].mxu0 }
 0x15e   : > { %v772_v38 = vpack.c.bf16 %v746_v35, %v745_v34  ;;  %v1293_v40 = vadd.f32 %v1292_v37, %v1291_v36  ;;  %v1294_v41 = vpop.f32.mrb[26].mxu0 }
 0x15f   : > { %v1295_v42 = vpop.f32.mrb[27].mxu0 }
 0x160   : > { %v657_v43 = vadd.f32 %v1293_v40, %v1890_v53  ;;  %v1296_v44 = vadd.f32 %v1295_v42, %v1294_v41  ;;  %1388 = vmatmul.mubr.msk.bf16.gmra.mrb[24].mxu1 %vm822_vm0, %v772_v38 }
 0x162   : > { %v660_v45 = vadd.f32 %v1296_v44, %v1890_v53  ;;  %v747_v46 = vmax.f32 %v657_v43, 0.0 }
 0x164   : > { %v748_v47 = vmax.f32 %v660_v45, 0.0  ;;  %v1297_v48 = vpop.f32.mrb[28].mxu0 }
 0x165   : > { %v1298_v49 = vpop.f32.mrb[29].mxu0 }
 0x166   : > { %v773_v50 = vpack.c.bf16 %v748_v47, %v747_v46  ;;  %v1299_v51 = vadd.f32 %v1298_v49, %v1297_v48  ;;  %v1300_v52 = vpop.f32.mrb[30].mxu0 }
 0x167   : > { %v1301_v54 = vpop.f32.mrb[31].mxu0 }
 0x168   : > { %v665_v55 = vadd.f32 %v1299_v51, %v1890_v53  ;;  %v1302_v56 = vadd.f32 %v1301_v54, %v1300_v52  ;;  %1391 = vmatprep.mubr.msk.bf16.mxu1 %vm822_vm0, %v773_v50 }
 0x16a   : > { %v668_v57 = vadd.f32 %v1302_v56, %v1890_v53  ;;  %v749_v58 = vmax.f32 %v665_v55, 0.0 }
 0x16c   : > { %v750_v59 = vmax.f32 %v668_v57, 0.0  ;;  %v1303_v60 = vpop.f32.mrb[32].mxu0 }
 0x16d   : > { %v1304_v61 = vpop.f32.mrb[33].mxu0 }
 0x16e   : > { %v774_v63 = vpack.c.bf16 %v750_v59, %v749_v58  ;;  %v1305_v0 = vadd.f32 %v1304_v61, %v1303_v60  ;;  %v1306_v1 = vpop.f32.mrb[34].mxu0 }
 0x16f   : > { %v1307_v2 = vpop.f32.mrb[35].mxu0 }
 0x170   : > { %v673_v3 = vadd.f32 %v1305_v0, %v1890_v53  ;;  %v1308_v4 = vadd.f32 %v1307_v2, %v1306_v1  ;;  %1392 = vmatmul.mubr.msk.bf16.gmra.mrb[28].mxu1 %vm822_vm0, %v774_v63 }
 0x172   : > { %v676_v5 = vadd.f32 %v1308_v4, %v1890_v53  ;;  %v751_v6 = vmax.f32 %v673_v3, 0.0 }
 0x174   : > { %v752_v7 = vmax.f32 %v676_v5, 0.0  ;;  %v1309_v8 = vpop.f32.mrb[36].mxu0 }
 0x175   : > { %v1310_v9 = vpop.f32.mrb[37].mxu0 }
 0x176   : > { %v775_v10 = vpack.c.bf16 %v752_v7, %v751_v6  ;;  %v1311_v11 = vadd.f32 %v1310_v9, %v1309_v8  ;;  %v1312_v12 = vpop.f32.mrb[38].mxu0 }
 0x177   : > { %v1313_v13 = vpop.f32.mrb[39].mxu0 }
 0x178   : > { %v681_v14 = vadd.f32 %v1311_v11, %v1890_v53  ;;  %v1314_v15 = vadd.f32 %v1313_v13, %v1312_v12  ;;  %1395 = vmatprep.mubr.msk.bf16.mxu1 %vm822_vm0, %v775_v10 }
 0x17a   : > { %v684_v16 = vadd.f32 %v1314_v15, %v1890_v53  ;;  %v753_v18 = vmax.f32 %v681_v14, 0.0 }
 0x17c   : > { %v754_v20 = vmax.f32 %v684_v16, 0.0  ;;  %v1315_v21 = vpop.f32.mrb[40].mxu0 }
 0x17d   : > { %v1316_v22 = vpop.f32.mrb[41].mxu0 }
 0x17e   : > { %v776_v23 = vpack.c.bf16 %v754_v20, %v753_v18  ;;  %v1317_v24 = vadd.f32 %v1316_v22, %v1315_v21  ;;  %v1318_v25 = vpop.f32.mrb[42].mxu0 }
 0x17f   : > { %v1319_v26 = vpop.f32.mrb[43].mxu0 }
 0x180   : > { %v689_v27 = vadd.f32 %v1317_v24, %v1890_v53  ;;  %v1320_v28 = vadd.f32 %v1319_v26, %v1318_v25  ;;  %1396 = vmatmul.mubr.msk.bf16.gmra.mrb[32].mxu1 %vm822_vm0, %v776_v23 }
 0x182   : > { %v692_v29 = vadd.f32 %v1320_v28, %v1890_v53  ;;  %v755_v30 = vmax.f32 %v689_v27, 0.0 }
 0x184   : > { %v756_v31 = vmax.f32 %v692_v29, 0.0  ;;  %v1321_v32 = vpop.f32.mrb[44].mxu0 }
 0x185   : > { %v1322_v33 = vpop.f32.mrb[45].mxu0 }
 0x186   : > { %v777_v34 = vpack.c.bf16 %v756_v31, %v755_v30  ;;  %v1323_v35 = vadd.f32 %v1322_v33, %v1321_v32  ;;  %v1324_v36 = vpop.f32.mrb[46].mxu0 }
 0x187   : > { %v1325_v37 = vpop.f32.mrb[47].mxu0 }
 0x188   : > { %v697_v38 = vadd.f32 %v1323_v35, %v1890_v53  ;;  %v1326_v40 = vadd.f32 %v1325_v37, %v1324_v36  ;;  %1399 = vmatprep.mubr.msk.bf16.mxu1 %vm822_vm0, %v777_v34 }
 0x18a   : > { %v700_v41 = vadd.f32 %v1326_v40, %v1890_v53  ;;  %v757_v42 = vmax.f32 %v697_v38, 0.0  ;;  %v1955_v53 = vld [vmem:[%s2080_s4] ss:$0 sm:$0xff] }
 0x18c   : > { %v758_v43 = vmax.f32 %v700_v41, 0.0 }
 0x18e   : > { %v778_v44 = vpack.c.bf16 %v758_v43, %v757_v42 }
 0x190   : > { %1400 = vmatmul.mubr.msk.bf16.gmra.mrb[36].mxu1 %vm822_vm0, %v778_v44 }
 0x191   : > { %1403 = vmatprep.mubr.msk.bf16.mxu1 %vm822_vm0, %v1896_v17 }
 0x198   : > { %1404 = vmatmul.mubr.msk.bf16.gmra.mrb[40].mxu1 %vm822_vm0, %v1903_v39 }
 0x199   : > { %1407 = vmatprep.mubr.msk.bf16.mxu1 %vm822_vm0, %v1910_v62 }
 0x1a0   : > { %1408 = vmatmul.mubr.msk.bf16.gmra.mrb[44].mxu1 %vm822_vm0, %v1917_v19 }
 0x213   : > { %v1381_v45 = vpop.f32.mrb[16].mxu1 }
 0x214   : > { %v914_v46 = vadd.f32 %v1381_v45, %v1955_v53  ;;  %v905_v47 = vpop.f32.mrb[17].mxu1 }
 0x215   : > { %v906_v17 = vadd.f32 %v1955_v53, %v905_v47  ;;  %v1382_v48 = vpop.f32.mrb[18].mxu1 }
 0x216   : > { %1034 = vst [vmem:[%s1961_s8 + $0x10] sm:$0xff] %v914_v46  ;;  %v917_v39 = vadd.f32 %v1382_v48, %v1955_v53  ;;  %v908_v62 = vpop.f32.mrb[19].mxu1 }
 0x217   : > { %1032 = vst [vmem:[%s1961_s8] sm:$0xff] %v906_v17  ;;  %v909_v19 = vadd.f32 %v1955_v53, %v908_v62 }
 0x218   : > { %1035 = vst [vmem:[%s1961_s8 + $0x18] sm:$0xff] %v917_v39 }
 0x219   : > { %1033 = vst [vmem:[%s1961_s8 + $0x8] sm:$0xff] %v909_v19 }
 0x223   : > { %v1385_v49 = vpop.f32.mrb[20].mxu1 }
 0x224   : > { %v930_v50 = vadd.f32 %v1385_v49, %v1955_v53  ;;  %v921_v51 = vpop.f32.mrb[21].mxu1 }
 0x225   : > { %v922_v52 = vadd.f32 %v1955_v53, %v921_v51  ;;  %v1386_v54 = vpop.f32.mrb[22].mxu1 }
 0x226   : > { %1038 = vst [vmem:[%s1961_s8 + $0x30] sm:$0xff] %v930_v50  ;;  %v933_v55 = vadd.f32 %v1386_v54, %v1955_v53  ;;  %v924_v56 = vpop.f32.mrb[23].mxu1 }
 0x227   : > { %1036 = vst [vmem:[%s1961_s8 + $0x20] sm:$0xff] %v922_v52  ;;  %v925_v57 = vadd.f32 %v1955_v53, %v924_v56 }
 0x228   : > { %1039 = vst [vmem:[%s1961_s8 + $0x38] sm:$0xff] %v933_v55 }
 0x229   : > { %1037 = vst [vmem:[%s1961_s8 + $0x28] sm:$0xff] %v925_v57 }
 0x233   : > { %v1389_v58 = vpop.f32.mrb[24].mxu1 }
 0x234   : > { %v946_v59 = vadd.f32 %v1389_v58, %v1955_v53  ;;  %v937_v60 = vpop.f32.mrb[25].mxu1 }
 0x235   : > { %v938_v61 = vadd.f32 %v1955_v53, %v937_v60  ;;  %v1390_v63 = vpop.f32.mrb[26].mxu1 }
 0x236   : > { %1042 = vst [vmem:[%s1961_s8 + $0x50] sm:$0xff] %v946_v59  ;;  %v949_v0 = vadd.f32 %v1390_v63, %v1955_v53  ;;  %v940_v1 = vpop.f32.mrb[27].mxu1 }
 0x237   : > { %1040 = vst [vmem:[%s1961_s8 + $0x40] sm:$0xff] %v938_v61  ;;  %v941_v2 = vadd.f32 %v1955_v53, %v940_v1 }
 0x238   : > { %1043 = vst [vmem:[%s1961_s8 + $0x58] sm:$0xff] %v949_v0 }
 0x239   : > { %1041 = vst [vmem:[%s1961_s8 + $0x48] sm:$0xff] %v941_v2 }
 0x243   : > { %v1393_v3 = vpop.f32.mrb[28].mxu1 }
 0x244   : > { %v962_v4 = vadd.f32 %v1393_v3, %v1955_v53  ;;  %v953_v5 = vpop.f32.mrb[29].mxu1 }
 0x245   : > { %v954_v6 = vadd.f32 %v1955_v53, %v953_v5  ;;  %v1394_v7 = vpop.f32.mrb[30].mxu1 }
 0x246   : > { %1046 = vst [vmem:[%s1961_s8 + $0x70] sm:$0xff] %v962_v4  ;;  %v965_v8 = vadd.f32 %v1394_v7, %v1955_v53  ;;  %v956_v9 = vpop.f32.mrb[31].mxu1 }
 0x247   : > { %1044 = vst [vmem:[%s1961_s8 + $0x60] sm:$0xff] %v954_v6  ;;  %v957_v10 = vadd.f32 %v1955_v53, %v956_v9 }
 0x248   : > { %1047 = vst [vmem:[%s1961_s8 + $0x78] sm:$0xff] %v965_v8 }
 0x249   : > { %1045 = vst [vmem:[%s1961_s8 + $0x68] sm:$0xff] %v957_v10 }
 0x253   : > { %v1397_v11 = vpop.f32.mrb[32].mxu1 }
 0x254   : > { %v978_v12 = vadd.f32 %v1397_v11, %v1955_v53  ;;  %v969_v13 = vpop.f32.mrb[33].mxu1 }
 0x255   : > { %v970_v14 = vadd.f32 %v1955_v53, %v969_v13  ;;  %v1398_v15 = vpop.f32.mrb[34].mxu1 }
 0x256   : > { %1050 = vst [vmem:[%s1961_s8 + $0x90] sm:$0xff] %v978_v12  ;;  %v981_v16 = vadd.f32 %v1398_v15, %v1955_v53  ;;  %v972_v18 = vpop.f32.mrb[35].mxu1 }
 0x257   : > { %1048 = vst [vmem:[%s1961_s8 + $0x80] sm:$0xff] %v970_v14  ;;  %v973_v20 = vadd.f32 %v1955_v53, %v972_v18 }
 0x258   : > { %1051 = vst [vmem:[%s1961_s8 + $0x98] sm:$0xff] %v981_v16 }
 0x259   : > { %1049 = vst [vmem:[%s1961_s8 + $0x88] sm:$0xff] %v973_v20 }
 0x263   : > { %v1401_v21 = vpop.f32.mrb[36].mxu1 }
 0x264   : > { %v994_v22 = vadd.f32 %v1401_v21, %v1955_v53  ;;  %v985_v23 = vpop.f32.mrb[37].mxu1 }
 0x265   : > { %v986_v24 = vadd.f32 %v1955_v53, %v985_v23  ;;  %v1402_v25 = vpop.f32.mrb[38].mxu1 }
 0x266   : > { %1054 = vst [vmem:[%s1961_s8 + $0xb0] sm:$0xff] %v994_v22  ;;  %v997_v26 = vadd.f32 %v1402_v25, %v1955_v53  ;;  %v988_v27 = vpop.f32.mrb[39].mxu1 }
 0x267   : > { %1052 = vst [vmem:[%s1961_s8 + $0xa0] sm:$0xff] %v986_v24  ;;  %v989_v28 = vadd.f32 %v1955_v53, %v988_v27 }
 0x268   : > { %1055 = vst [vmem:[%s1961_s8 + $0xb8] sm:$0xff] %v997_v26 }
 0x269   : > { %1053 = vst [vmem:[%s1961_s8 + $0xa8] sm:$0xff] %v989_v28 }
 0x26b   : > { %v1405_v29 = vpop.f32.mrb[40].mxu1 }
 0x26c   : > { %v1010_v30 = vadd.f32 %v1405_v29, %v1955_v53  ;;  %v1001_v31 = vpop.f32.mrb[41].mxu1 }
 0x26d   : > { %v1002_v32 = vadd.f32 %v1955_v53, %v1001_v31  ;;  %v1406_v33 = vpop.f32.mrb[42].mxu1 }
 0x26e   : > { %1058 = vst [vmem:[%s1961_s8 + $0xd0] sm:$0xff] %v1010_v30  ;;  %v1013_v34 = vadd.f32 %v1406_v33, %v1955_v53  ;;  %v1004_v35 = vpop.f32.mrb[43].mxu1 }
 0x26f   : > { %1056 = vst [vmem:[%s1961_s8 + $0xc0] sm:$0xff] %v1002_v32  ;;  %v1005_v36 = vadd.f32 %v1955_v53, %v1004_v35 }
 0x270   : > { %1059 = vst [vmem:[%s1961_s8 + $0xd8] sm:$0xff] %v1013_v34 }
 0x271   : > { %1057 = vst [vmem:[%s1961_s8 + $0xc8] sm:$0xff] %v1005_v36 }
 0x273   : > { %v1409_v37 = vpop.f32.mrb[44].mxu1 }
 0x274   : > { %v1026_v38 = vadd.f32 %v1409_v37, %v1955_v53  ;;  %v1017_v40 = vpop.f32.mrb[45].mxu1 }
 0x275   : > { %v1018_v41 = vadd.f32 %v1955_v53, %v1017_v40  ;;  %v1410_v42 = vpop.f32.mrb[46].mxu1 }
 0x276   : > { %1062 = vst [vmem:[%s1961_s8 + $0xf0] sm:$0xff] %v1026_v38  ;;  %v1029_v43 = vadd.f32 %v1410_v42, %v1955_v53  ;;  %v1020_v44 = vpop.f32.mrb[47].mxu1 }
 0x277   : > { %1060 = vst [vmem:[%s1961_s8 + $0xe0] sm:$0xff] %v1018_v41  ;;  %v1021_v45 = vadd.f32 %v1955_v53, %v1020_v44 }
 0x278   : > { %1063 = vst [vmem:[%s1961_s8 + $0xf8] sm:$0xff] %v1029_v43 }
 0x279   : > { %1061 = vst [vmem:[%s1961_s8 + $0xe8] sm:$0xff] %v1021_v45 }
 0x27a   : > { %1588 = shalt.err (!%p1585_p2)
}
 0x27b   : > { %s1589_s26 = scalar_lea.hbm %s2026_s29, 4096  ;;  %s1593_s15 = scalar_lea.hbm %s2081_s5, 8192 }
 0x27c   : > { %p1590_p4 = scmp.ne.s32.totalorder %s2026_s29, %s1589_s26  ;;  %p1594_p9 = scmp.lt.u32.totalorder %s2026_s29, %s2081_s5 }
 0x27d   : > { %p1595_p1 = scmp.lt.u32.totalorder %s1593_s15, %s1589_s26  ;;  %p1597_p6 = scmp.lt.u32.totalorder %s1589_s26, %s2026_s29 }
 0x27e   : > { %p1591_p5 = pnand %p1590_p4, %p2088_p11 }
 0x27f   : > { %p1596_p3 = por %p1595_p1, %p1594_p9 }
 0x280   : > { %p1592_p7 = pneg %p1591_p5 }
 0x281   : > { %p1598_p12 = por %p1597_p6, %p1596_p3 }
 0x283   : > { %p1599_p13 = pnand %p1598_p12, %p1592_p7 }
 0x285   : > { %1602 = shalt.err (!%p1599_p13)
}
 0x286   : > { %s1647_s25 = smov 128   ;;  %s1648_s9 = smov 8  }
 0x287   : > { %1429 = dma.vmem_to_hbm [thread:$0]  (%p2088_p11), %s2028_s7, 4096, %s2026_s29, %s1065_s22, %s1647_s25, %s1647_s25, %s1648_s9  }
 0x288 PF: > { %s1093_s10 = sand.u32 1, %s1629_s18   ;;  %p2089_p8 = scmp.ne.s32.totalorder %s2086_s6, 0 }
 0x289   : > { %p2090_p10 = scmp.ge.s32.totalorder %s1641_s21, 2  ;;  %s1094_s11 = scalar_lea.sflag [#allocation4], %s1093_s10 }
 0x28b   : > { %p1436_p0 = pnand %p2090_p10, %p2089_p8 }
 0x28d   : > { %1624 = dma.done.wait (!%p1436_p0), %s1094_s11, 4096  }
 0x28e   : > { %1626 = vsyncadd (!%p1436_p0), %s1094_s11, 4294963200  ;;  %p18_p2 = scmp.ge.s32.totalorder %s1704_s24, 4   ;;  %s2091_s18 = smov %s1633_s19 }
 0x28f   : > { %s2092_s19 = smov %s1637_s20  ;;  %s2093_s20 = smov %s1716_s27 }
 0x290   : > { %s2094_s21 = smov %s1704_s24  ;;  %20 = sbr.rel (!%p18_p2) target bundleno = 5 (0x5), region = 85 }
 0x297   :  { %1099 = vsyncpa [#allocation3], 1 }
 0x298   :  { %1101 = vsyncpa [#allocation3 + $0x1], 1 }
 0x299   :  { %1102 = vsyncpa [#allocation4], 1 }
 0x29a   :  { %1104 = vsyncpa [#allocation4 + $0x1], 1 }

</bundles_post_ra>
